<compile_context>
chip_gen: v5e
topology: v5e:2x2
jax: 0.10.0
libtpu: 0.0.40
codegen_flags: <defaults>
</compile_context>

<pallas_src>
import functools

import numpy as np
import jax
import jax.numpy as jnp
from jax import lax
from jax.experimental import pallas as pl
from jax.experimental.pallas import tpu as pltpu

HIDDEN = 512


def _round_up(n, m):
    return ((n + m - 1) // m) * m


def _tpu_info():
    """Returns (vmem_capacity_bytes, tensorcores_per_chip_hint, device_kind)."""
    kind = ""
    try:
        kind = jax.devices()[0].device_kind.lower()
    except Exception:
        pass
    vmem_cap = None
    try:
        vmem_cap = int(pltpu.get_tpu_info().vmem_capacity_bytes)
    except Exception:
        vmem_cap = None
    if vmem_cap is None:
        # v4/v5e/v6e: 128 MiB per TC; v7x: 64 MiB per TC.  Default conservatively.
        if any(g in kind for g in ("v4", "v5", "v6")):
            vmem_cap = 128 * 1024 * 1024
        else:
            vmem_cap = 64 * 1024 * 1024
    two_tc = ("v7" in kind) or ("7x" in kind) or ("v4" in kind)
    return vmem_cap, (2 if two_tc else 1), kind


def _resident_vmem_est(tile_b, d, x_bytes, w_bytes, cast_x):
    # x tile (double-buffered) + in-kernel bf16 copy of x + resident W1 (bf16,
    # single-buffered) + (512, tile_b) f32 h_t spill + bias/w2 columns + output.
    return (
        2 * tile_b * d * x_bytes
        + (tile_b * d * w_bytes if cast_x else 0)
        + HIDDEN * d * w_bytes
        + HIDDEN * tile_b * 4
        + 2 * HIDDEN * 4
        + 2 * tile_b * 4
    )


def _ktiled_vmem_est(tile_b, tk, x_bytes, w_bytes, cast_x):
    return (
        2 * tile_b * tk * x_bytes          # x K-slab, double-buffered
        + (tile_b * tk * w_bytes if cast_x else 0)
        + 2 * HIDDEN * tk * w_bytes        # W1 K-slab, double-buffered
        + HIDDEN * tile_b * 4              # f32 accumulator scratch
        + HIDDEN * tile_b * 4              # epilogue h_t temp
        + 2 * HIDDEN * 4
        + 2 * tile_b * 4
    )


def _weight_spec(block_shape, index_map, single_buffer):
    """BlockSpec for a constant-index (resident) input; single-buffer if possible."""
    if single_buffer:
        try:
            return pl.BlockSpec(block_shape, index_map, pipeline_mode=pl.Buffered(1))
        except (TypeError, AttributeError):
            pass
    return pl.BlockSpec(block_shape, index_map)


def _disc_kernel(x_ref, w1_ref, b1_ref, w2_ref, b2_ref, o_ref, *, fc1_dtype):
    # x_ref : (TB, D)        one batch tile (f32 or bf16)
    # w1_ref: (512, D)       fc1.weight, already in fc1_dtype, resident
    # b1_ref: (512, 1) f32   fc1.bias column
    # w2_ref: (512, 1) f32   fc2.weight column
    # b2_ref: (1,)     f32   fc2.bias (SMEM scalar)
    # o_ref : (1, 1, TB) f32 lane-dense output row
    x_op = x_ref[...]
    if x_op.dtype != fc1_dtype:
        x_op = x_op.astype(fc1_dtype)
    # fc1 on the MXU: contract last dims -> (512, TB), f32 accumulation.
    h_t = lax.dot_general(
        w1_ref[...], x_op,
        dimension_numbers=(((1,), (1,)), ((), ())),
        preferred_element_type=jnp.float32,
    )
    h_t = jnp.maximum(h_t + b1_ref[...], 0.0)            # bias (lane bcast) + ReLU
    # fc2 (N=1): VPU multiply + sublane reduction -> (1, TB), then scalar bias.
    z = jnp.sum(h_t * w2_ref[...], axis=0, keepdims=True) + b2_ref[0]
    y = 1.0 / (1.0 + jnp.exp(-z))                         # sigmoid (EUP exp)
    o_ref[...] = y.reshape(o_ref.shape).astype(o_ref.dtype)


def _disc_kernel_ktiled(x_ref, w1_ref, b1_ref, w2_ref, b2_ref, o_ref, acc_ref,
                        *, fc1_dtype):
    # K-tiled path: grid=(batch_tiles, K_tiles); K last, "arbitrary".
    k = pl.program_id(1)

    @pl.when(k == 0)
    def _():
        acc_ref[...] = jnp.zeros_like(acc_ref)

    x_op = x_ref[...]
    if x_op.dtype != fc1_dtype:
        x_op = x_op.astype(fc1_dtype)
    acc_ref[...] += lax.dot_general(
        w1_ref[...], x_op,
        dimension_numbers=(((1,), (1,)), ((), ())),
        preferred_element_type=jnp.float32,
    )

    @pl.when(k == pl.num_programs(1) - 1)
    def _():
        h_t = jnp.maximum(acc_ref[...] + b1_ref[...], 0.0)
        z = jnp.sum(h_t * w2_ref[...], axis=0, keepdims=True) + b2_ref[0]
        y = 1.0 / (1.0 + jnp.exp(-z))
        o_ref[...] = y.reshape(o_ref.shape).astype(o_ref.dtype)


def discriminator_forward(x, w1, b1, w2, b2, *, tile_b=None,
                          fc1_dtype=jnp.bfloat16, k_tile=None):
    """Forward pass of Discriminator.

    x : (B, D)            (f32; bf16 accepted directly and not re-cast)
    w1: (512, D) fc1.weight     b1: (512,) fc1.bias
    w2: (1, 512) fc2.weight     b2: (1,)   fc2.bias
    Returns (B, 1) f32 sigmoid scores.
    Pass fc1_dtype=jnp.float32 for bit-closeness to a pure-f32 torch module.
    """
    x = jnp.asarray(x)
    B, D = x.shape
    assert w1.shape == (HIDDEN, D)

    vmem_cap, tc_per_chip, kind = _tpu_info()
    vmem_budget = (vmem_cap * 3) // 4                    # leave ~25% headroom

    # fc1 weights cast once here (review item: no per-step VPU cast of W1).
    w1_op = jnp.asarray(w1).astype(fc1_dtype)
    cast_x = x.dtype != jnp.dtype(fc1_dtype)
    x_bytes = x.dtype.itemsize
    w_bytes = np.dtype(fc1_dtype).itemsize

    # --- batch tile: multiple of 128 (lane-dense output / full MXU passes); ----
    # --- enlarge for small D to amortize per-grid-step overhead. ---------------
    if tile_b is None:
        if D <= 512:
            tile_b = 1024 if ("v5" in kind and D >= 256) else 2048
        else:
            tile_b = 512
    tile_b = max(128, min(_round_up(tile_b, 128), _round_up(B, 128)))

    # --- resident-W1 vs K-tiled path selection (VMEM-budget driven) ------------
    if k_tile is None:
        while (tile_b > 256 and
               _resident_vmem_est(tile_b, D, x_bytes, w_bytes, cast_x) > vmem_budget):
            tile_b -= 128
        if _resident_vmem_est(tile_b, D, x_bytes, w_bytes, cast_x) > vmem_budget:
            k_tile = 512
    if k_tile is not None:
        k_tile = min(_round_up(k_tile, 128), _round_up(D, 128))
        while (k_tile > 128 and
               _ktiled_vmem_est(tile_b, k_tile, x_bytes, w_bytes, cast_x) > vmem_budget):
            k_tile -= 128

    # --- batch padding; keep the parallel axis balanced across TCs (v7x/v4) ----
    b_pad = _round_up(B, tile_b)
    num_tiles = b_pad // tile_b
    if tc_per_chip > 1 and num_tiles > 1 and num_tiles % tc_per_chip != 0:
        num_tiles = _round_up(num_tiles, tc_per_chip)
        b_pad = num_tiles * tile_b
    if b_pad != B:
        x = jnp.pad(x, ((0, b_pad - B), (0, 0)))

    b1_col = jnp.asarray(b1).astype(jnp.float32).reshape(HIDDEN, 1)
    w2_col = jnp.asarray(w2).astype(jnp.float32).reshape(HIDDEN, 1)
    b2_s = jnp.asarray(b2).astype(jnp.float32).reshape(1)

    if k_tile is None:
        # ---------------- resident-W1 path ----------------
        vmem_est = _resident_vmem_est(tile_b, D, x_bytes, w_bytes, cast_x)
        vmem_limit = int(min(vmem_budget, max(2 * vmem_est, 32 * 1024 * 1024)))

        def run(single_buffer_weights):
            grid_spec = pltpu.PrefetchScalarGridSpec(
                num_scalar_prefetch=0,
                grid=(num_tiles,),
                in_specs=[
                    pl.BlockSpec((tile_b, D), lambda i: (i, 0)),             # x tile
                    _weight_spec((HIDDEN, D), lambda i: (0, 0),
                                 single_buffer_weights),                     # W1
                    _weight_spec((HIDDEN, 1), lambda i: (0, 0),
                                 single_buffer_weights),                     # b1 col
                    _weight_spec((HIDDEN, 1), lambda i: (0, 0),
                                 single_buffer_weights),                     # w2 col
                    pl.BlockSpec(memory_space=pltpu.MemorySpace.SMEM),       # b2
                ],
                out_specs=pl.BlockSpec((1, 1, tile_b), lambda i: (i, 0, 0)),
            )
            return pl.pallas_call(
                functools.partial(_disc_kernel, fc1_dtype=fc1_dtype),
                out_shape=jax.ShapeDtypeStruct((num_tiles, 1, tile_b), jnp.float32),
                grid_spec=grid_spec,
                compiler_params=pltpu.CompilerParams(
                    dimension_semantics=("parallel",),
                    vmem_limit_bytes=vmem_limit,
                ),
            )(x, w1_op, b1_col, w2_col, b2_s)

        try:
            out = run(True)
        except Exception:
            out = run(False)   # fall back to default double-buffering
    else:
        # ---------------- K-tiled path (large D / tight VMEM, e.g. v7x) --------
        d_pad = _round_up(D, k_tile)
        if d_pad != D:
            x = jnp.pad(x, ((0, 0), (0, d_pad - D)))
            w1_op = jnp.pad(w1_op, ((0, 0), (0, d_pad - D)))
        num_k = d_pad // k_tile
        vmem_est = _ktiled_vmem_est(tile_b, k_tile, x_bytes, w_bytes, cast_x)
        vmem_limit = int(min(vmem_budget, max(2 * vmem_est, 32 * 1024 * 1024)))

        out = pl.pallas_call(
            functools.partial(_disc_kernel_ktiled, fc1_dtype=fc1_dtype),
            out_shape=jax.ShapeDtypeStruct((num_tiles, 1, tile_b), jnp.float32),
            grid_spec=pltpu.PrefetchScalarGridSpec(
                num_scalar_prefetch=0,
                grid=(num_tiles, num_k),
                in_specs=[
                    pl.BlockSpec((tile_b, k_tile), lambda i, k: (i, k)),     # x slab
                    pl.BlockSpec((HIDDEN, k_tile), lambda i, k: (0, k)),     # W1 slab
                    pl.BlockSpec((HIDDEN, 1), lambda i, k: (0, 0)),          # b1 col
                    pl.BlockSpec((HIDDEN, 1), lambda i, k: (0, 0)),          # w2 col
                    pl.BlockSpec(memory_space=pltpu.MemorySpace.SMEM),       # b2
                ],
                out_specs=pl.BlockSpec((1, 1, tile_b), lambda i, k: (i, 0, 0)),
                scratch_shapes=[pltpu.VMEM((HIDDEN, tile_b), jnp.float32)],
            ),
            compiler_params=pltpu.CompilerParams(
                dimension_semantics=("parallel", "arbitrary"),
                vmem_limit_bytes=vmem_limit,
            ),
        )(x, w1_op, b1_col, w2_col, b2_s)

    return out.reshape(-1)[:B].reshape(B, 1)


def _ref_forward(x, w1, b1, w2, b2, fc1_dtype=jnp.bfloat16):
    # Mirrors kernel numerics: fc1 in fc1_dtype operands, f32 accumulation.
    h = jnp.dot(x.astype(fc1_dtype), w1.T.astype(fc1_dtype),
                preferred_element_type=jnp.float32) + b1
    h = jnp.maximum(h, 0.0)
    z = h @ w2.reshape(HIDDEN, 1) + b2
    return 1.0 / (1.0 + jnp.exp(-z))


if __name__ == "__main__":
    key = jax.random.PRNGKey(0)

    def make_params(pkey, d):
        k_w1, k_b1, k_w2, k_b2 = jax.random.split(pkey, 4)
        lim1 = 1.0 / jnp.sqrt(jnp.float32(d))
        w1 = jax.random.uniform(k_w1, (HIDDEN, d), jnp.float32, -lim1, lim1)
        b1 = jax.random.uniform(k_b1, (HIDDEN,), jnp.float32, -lim1, lim1)
        lim2 = 1.0 / jnp.sqrt(jnp.float32(HIDDEN))
        w2 = jax.random.uniform(k_w2, (1, HIDDEN), jnp.float32, -lim2, lim2)
        b2 = jax.random.uniform(k_b2, (1,), jnp.float32, -lim2, lim2)
        return w1, b1, w2, b2

    k_x, k_p, k_x2, k_p2 = jax.random.split(key, 4)

    # Small shapes consistent with the module: batch=8, input_size=32.
    B, D = 8, 32
    x = jax.random.normal(k_x, (B, D), dtype=jnp.float32)
    w1, b1, w2, b2 = make_params(k_p, D)
    out = discriminator_forward(x, w1, b1, w2, b2)
    jax.block_until_ready(out)
    ref = _ref_forward(x, w1, b1, w2, b2)
    assert out.shape == (B, 1)
    assert jnp.allclose(out, ref, atol=1e-3, rtol=1e-3), \
        float(jnp.max(jnp.abs(out - ref)))

    # Also exercise the K-tiled (large-D / tight-VMEM) path on a ragged batch.
    B2, D2 = 300, 256
    x2 = jax.random.normal(k_x2, (B2, D2), dtype=jnp.float32)
    w1b, b1b, w2b, b2b = make_params(k_p2, D2)
    out2 = discriminator_forward(x2, w1b, b1b, w2b, b2b, k_tile=128)
    jax.block_until_ready(out2)
    ref2 = _ref_forward(x2, w1b, b1b, w2b, b2b)
    assert out2.shape == (B2, 1)
    assert jnp.allclose(out2, ref2, atol=1e-3, rtol=1e-3), \
        float(jnp.max(jnp.abs(out2 - ref2)))

    # TODO(synk): train_discriminator / CountVectorizer / add_to_training_data /
    # pick_best_response are host-side data handling; only forward() is implemented.
    print("KERNEL_OK")
</pallas_src>

<mosaic_0001>
module attributes {stable_mosaic.version = 11 : i64} {
  func.func @_disc_kernel(%arg0: i32, %arg1: memref<128x32xf32, #tpu.memory_space<vmem>>, %arg2: memref<512x32xbf16, #tpu.memory_space<vmem>>, %arg3: memref<512x1xf32, #tpu.memory_space<vmem>>, %arg4: memref<512x1xf32, #tpu.memory_space<vmem>>, %arg5: memref<1xf32, #tpu.memory_space<smem>>, %arg6: memref<1x1x128xf32, #tpu.memory_space<vmem>>) attributes {dimension_semantics = [#tpu.dimension_semantics<parallel>], iteration_bounds = array<i64: 1>, scalar_prefetch = 0 : i64, scratch_operands = 0 : i64, tpu.core_type = #tpu.core_type<tc>, window_params = [{transform_indices = @transform_0, window_bounds = array<i64: 128, 32>}, {pipeline_mode = #tpu.pipeline_mode<synchronous>, transform_indices = @transform_1, window_bounds = array<i64: 512, 32>}, {pipeline_mode = #tpu.pipeline_mode<synchronous>, transform_indices = @transform_2, window_bounds = array<i64: 512, 1>}, {pipeline_mode = #tpu.pipeline_mode<synchronous>, transform_indices = @transform_3, window_bounds = array<i64: 512, 1>}, {transform_indices = @transform_4, window_bounds = array<i64: 1>}, {transform_indices = @transform_5, window_bounds = array<i64: 1, 1, 128>}]} {
    %c0 = arith.constant 0 : index
    %c0_0 = arith.constant 0 : index
    %0 = vector.load %arg1[%c0, %c0_0] : memref<128x32xf32, #tpu.memory_space<vmem>>, vector<128x32xf32>
    %1 = arith.truncf %0 : vector<128x32xf32> to vector<128x32xbf16>
    %c0_1 = arith.constant 0 : index
    %c0_2 = arith.constant 0 : index
    %2 = vector.load %arg2[%c0_1, %c0_2] : memref<512x32xbf16, #tpu.memory_space<vmem>>, vector<512x32xbf16>
    %cst = arith.constant dense<0.000000e+00> : vector<512x128xf32>
    %3 = tpu.matmul %2, %1, %cst {dimension_numbers = #tpu.dot_dimension_numbers<[1], [1], [0], [0], [0, 0, 1, 0], [], []>} : vector<512x32xbf16>, vector<128x32xbf16>, vector<512x128xf32> -> vector<512x128xf32>
    %c0_3 = arith.constant 0 : index
    %c0_4 = arith.constant 0 : index
    %4 = vector.load %arg3[%c0_3, %c0_4] : memref<512x1xf32, #tpu.memory_space<vmem>>, vector<512x1xf32>
    %5 = vector.broadcast %4 : vector<512x1xf32> to vector<512x128xf32>
    %6 = arith.addf %3, %5 : vector<512x128xf32>
    %cst_5 = arith.constant 0.000000e+00 : f32
    %7 = vector.broadcast %cst_5 : f32 to vector<512x128xf32>
    %8 = arith.maximumf %6, %7 : vector<512x128xf32>
    %c0_6 = arith.constant 0 : index
    %c0_7 = arith.constant 0 : index
    %9 = vector.load %arg4[%c0_6, %c0_7] : memref<512x1xf32, #tpu.memory_space<vmem>>, vector<512x1xf32>
    %10 = vector.broadcast %9 : vector<512x1xf32> to vector<512x128xf32>
    %11 = arith.mulf %8, %10 : vector<512x128xf32>
    %cst_8 = arith.constant dense<0.000000e+00> : vector<128xf32>
    %12 = vector.multi_reduction <add>, %11, %cst_8 [0] : vector<512x128xf32> to vector<128xf32>
    %13 = vector.shape_cast %12 : vector<128xf32> to vector<1x128xf32>
    %c0_9 = arith.constant 0 : index
    %14 = memref.load %arg5[%c0_9] : memref<1xf32, #tpu.memory_space<smem>>
    %15 = vector.broadcast %14 : f32 to vector<1x128xf32>
    %16 = arith.addf %13, %15 : vector<1x128xf32>
    %cst_10 = arith.constant 0.000000e+00 : f32
    %17 = vector.broadcast %cst_10 : f32 to vector<1x128xf32>
    %18 = arith.subf %17, %16 : vector<1x128xf32>
    %19 = math.exp %18 : vector<1x128xf32>
    %cst_11 = arith.constant 1.000000e+00 : f32
    %20 = vector.broadcast %cst_11 : f32 to vector<1x128xf32>
    %21 = arith.addf %20, %19 : vector<1x128xf32>
    %cst_12 = arith.constant 1.000000e+00 : f32
    %22 = vector.broadcast %cst_12 : f32 to vector<1x128xf32>
    %23 = arith.divf %22, %21 : vector<1x128xf32>
    %24 = vector.shape_cast %23 : vector<1x128xf32> to vector<1x1x128xf32>
    %c0_13 = arith.constant 0 : index
    %c0_14 = arith.constant 0 : index
    %c0_15 = arith.constant 0 : index
    %25 = vector.load %arg6[%c0_13, %c0_14, %c0_15] : memref<1x1x128xf32, #tpu.memory_space<vmem>>, vector<1x1x128xf32>
    tpu.vector_store %arg6[%c0_13, %c0_14, %c0_15], %24 {strides = array<i32>} : memref<1x1x128xf32, #tpu.memory_space<vmem>>, vector<1x1x128xf32>,
    return
  }
  func.func @transform_0(%arg0: i32) -> (i32, i32) {
    %c0_i32 = arith.constant 0 : i32
    %c0_i32_0 = arith.constant 0 : i32
    return %arg0, %c0_i32 : i32, i32
  }
  func.func @transform_1(%arg0: i32) -> (i32, i32) {
    %c0_i32 = arith.constant 0 : i32
    %c0_i32_0 = arith.constant 0 : i32
    %c0_i32_1 = arith.constant 0 : i32
    return %c0_i32, %c0_i32_0 : i32, i32
  }
  func.func @transform_2(%arg0: i32) -> (i32, i32) {
    %c0_i32 = arith.constant 0 : i32
    %c0_i32_0 = arith.constant 0 : i32
    %c0_i32_1 = arith.constant 0 : i32
    return %c0_i32, %c0_i32_0 : i32, i32
  }
  func.func @transform_3(%arg0: i32) -> (i32, i32) {
    %c0_i32 = arith.constant 0 : i32
    %c0_i32_0 = arith.constant 0 : i32
    %c0_i32_1 = arith.constant 0 : i32
    return %c0_i32, %c0_i32_0 : i32, i32
  }
  func.func @transform_4(%arg0: i32) -> i32 {
    %c0_i32 = arith.constant 0 : i32
    %c0_i32_0 = arith.constant 0 : i32
    return %c0_i32 : i32
  }
  func.func @transform_5(%arg0: i32) -> (i32, i32, i32) {
    %c0_i32 = arith.constant 0 : i32
    %c0_i32_0 = arith.constant 0 : i32
    %c0_i32_1 = arith.constant 0 : i32
    return %arg0, %c0_i32, %c0_i32_0 : i32, i32, i32
  }
}

module attributes {stable_mosaic.version = 11 : i64} {
  func.func @_disc_kernel(%arg0: i32, %arg1: memref<128x32xf32, #tpu.memory_space<vmem>>, %arg2: memref<512x32xbf16, #tpu.memory_space<vmem>>, %arg3: memref<512x1xf32, #tpu.memory_space<vmem>>, %arg4: memref<512x1xf32, #tpu.memory_space<vmem>>, %arg5: memref<1xf32, #tpu.memory_space<smem>>, %arg6: memref<1x1x128xf32, #tpu.memory_space<vmem>>) attributes {dimension_semantics = [#tpu.dimension_semantics<parallel>], iteration_bounds = array<i64: 1>, scalar_prefetch = 0 : i64, scratch_operands = 0 : i64, tpu.core_type = #tpu.core_type<tc>, window_params = [{transform_indices = @transform_0, window_bounds = array<i64: 128, 32>}, {pipeline_mode = #tpu.pipeline_mode<synchronous>, transform_indices = @transform_1, window_bounds = array<i64: 512, 32>}, {pipeline_mode = #tpu.pipeline_mode<synchronous>, transform_indices = @transform_2, window_bounds = array<i64: 512, 1>}, {pipeline_mode = #tpu.pipeline_mode<synchronous>, transform_indices = @transform_3, window_bounds = array<i64: 512, 1>}, {transform_indices = @transform_4, window_bounds = array<i64: 1>}, {transform_indices = @transform_5, window_bounds = array<i64: 1, 1, 128>}]} {
    %c0 = arith.constant 0 : index
    %c0_0 = arith.constant 0 : index
    %0 = vector.load %arg1[%c0, %c0_0] : memref<128x32xf32, #tpu.memory_space<vmem>>, vector<128x32xf32>
    %1 = arith.truncf %0 : vector<128x32xf32> to vector<128x32xbf16>
    %c0_1 = arith.constant 0 : index
    %c0_2 = arith.constant 0 : index
    %2 = vector.load %arg2[%c0_1, %c0_2] : memref<512x32xbf16, #tpu.memory_space<vmem>>, vector<512x32xbf16>
    %cst = arith.constant dense<0.000000e+00> : vector<512x128xf32>
    %3 = tpu.matmul %2, %1, %cst {dimension_numbers = #tpu.dot_dimension_numbers<[1], [1], [0], [0], [0, 0, 1, 0], [], []>} : vector<512x32xbf16>, vector<128x32xbf16>, vector<512x128xf32> -> vector<512x128xf32>
    %c0_3 = arith.constant 0 : index
    %c0_4 = arith.constant 0 : index
    %4 = vector.load %arg3[%c0_3, %c0_4] : memref<512x1xf32, #tpu.memory_space<vmem>>, vector<512x1xf32>
    %5 = vector.broadcast %4 : vector<512x1xf32> to vector<512x128xf32>
    %6 = arith.addf %3, %5 : vector<512x128xf32>
    %cst_5 = arith.constant 0.000000e+00 : f32
    %7 = vector.broadcast %cst_5 : f32 to vector<512x128xf32>
    %8 = arith.maximumf %6, %7 : vector<512x128xf32>
    %c0_6 = arith.constant 0 : index
    %c0_7 = arith.constant 0 : index
    %9 = vector.load %arg4[%c0_6, %c0_7] : memref<512x1xf32, #tpu.memory_space<vmem>>, vector<512x1xf32>
    %10 = vector.broadcast %9 : vector<512x1xf32> to vector<512x128xf32>
    %11 = arith.mulf %8, %10 : vector<512x128xf32>
    %cst_8 = arith.constant dense<0.000000e+00> : vector<128xf32>
    %12 = vector.multi_reduction <add>, %11, %cst_8 [0] : vector<512x128xf32> to vector<128xf32>
    %13 = vector.shape_cast %12 : vector<128xf32> to vector<1x128xf32>
    %c0_9 = arith.constant 0 : index
    %14 = memref.load %arg5[%c0_9] : memref<1xf32, #tpu.memory_space<smem>>
    %15 = vector.broadcast %14 : f32 to vector<1x128xf32>
    %16 = arith.addf %13, %15 : vector<1x128xf32>
    %cst_10 = arith.constant 0.000000e+00 : f32
    %17 = vector.broadcast %cst_10 : f32 to vector<1x128xf32>
    %18 = arith.subf %17, %16 : vector<1x128xf32>
    %19 = math.exp %18 : vector<1x128xf32>
    %cst_11 = arith.constant 1.000000e+00 : f32
    %20 = vector.broadcast %cst_11 : f32 to vector<1x128xf32>
    %21 = arith.addf %20, %19 : vector<1x128xf32>
    %cst_12 = arith.constant 1.000000e+00 : f32
    %22 = vector.broadcast %cst_12 : f32 to vector<1x128xf32>
    %23 = arith.divf %22, %21 : vector<1x128xf32>
    %24 = vector.shape_cast %23 : vector<1x128xf32> to vector<1x1x128xf32>
    %c0_13 = arith.constant 0 : index
    %c0_14 = arith.constant 0 : index
    %c0_15 = arith.constant 0 : index
    %25 = vector.load %arg6[%c0_13, %c0_14, %c0_15] : memref<1x1x128xf32, #tpu.memory_space<vmem>>, vector<1x1x128xf32>
    tpu.vector_store %arg6[%c0_13, %c0_14, %c0_15], %24 {strides = array<i32>} : memref<1x1x128xf32, #tpu.memory_space<vmem>>, vector<1x1x128xf32>,
    return
  }
  func.func @transform_0(%arg0: i32) -> (i32, i32) {
    %c0_i32 = arith.constant 0 : i32
    %c0_i32_0 = arith.constant 0 : i32
    return %arg0, %c0_i32 : i32, i32
  }
  func.func @transform_1(%arg0: i32) -> (i32, i32) {
    %c0_i32 = arith.constant 0 : i32
    %c0_i32_0 = arith.constant 0 : i32
    %c0_i32_1 = arith.constant 0 : i32
    return %c0_i32, %c0_i32_0 : i32, i32
  }
  func.func @transform_2(%arg0: i32) -> (i32, i32) {
    %c0_i32 = arith.constant 0 : i32
    %c0_i32_0 = arith.constant 0 : i32
    %c0_i32_1 = arith.constant 0 : i32
    return %c0_i32, %c0_i32_0 : i32, i32
  }
  func.func @transform_3(%arg0: i32) -> (i32, i32) {
    %c0_i32 = arith.constant 0 : i32
    %c0_i32_0 = arith.constant 0 : i32
    %c0_i32_1 = arith.constant 0 : i32
    return %c0_i32, %c0_i32_0 : i32, i32
  }
  func.func @transform_4(%arg0: i32) -> i32 {
    %c0_i32 = arith.constant 0 : i32
    %c0_i32_0 = arith.constant 0 : i32
    return %c0_i32 : i32
  }
  func.func @transform_5(%arg0: i32) -> (i32, i32, i32) {
    %c0_i32 = arith.constant 0 : i32
    %c0_i32_0 = arith.constant 0 : i32
    %c0_i32_1 = arith.constant 0 : i32
    return %arg0, %c0_i32, %c0_i32_0 : i32, i32, i32
  }
}

</mosaic_0001>

<bundles_post_ra>
// kernel: tpu_custom_call.1
= control target key start
LH: loop header
LB: loop body
LE: loop exit
PB: predicated region body
PF: predicated region fallthrough
CT: control target
= control target key end

     0   :  { %v1815_v3 = vmov 0   ;;  %vm654_vm0 = vcmask 261120   ;;  %s2754_s0 = inlined_call_operand.vmem [shape: f32[128,32], index: 0, kind: input, shape index: {}]   ;;  %s2755_s1 = inlined_call_operand.vmem [shape: bf16[512,32], index: 1, kind: input, shape index: {}]   ;;  %s2756_s2 = inlined_call_operand.vmem [shape: f32[512,1], index: 2, kind: input, shape index: {}]   ;;  %s2757_s3 = inlined_call_operand.vmem [shape: f32[512,1], index: 3, kind: input, shape index: {}]   ;;  %s2758_s4 = inlined_call_operand.<no memory space> [shape: f32[1], index: 4, kind: input, shape index: {}]   ;;  %s2759_s5 = inlined_call_operand.hbm [shape: f32[1,1,128], index: 5, kind: output, shape index: {}]  }
   0x1   :  { %v114_v0 = vld [vmem:[%s2756_s2 + $0x20] sm:$0xff]  ;;  %v112_v1 = vld [vmem:[%s2756_s2 + $0x10] sm:$0xff]  ;;  %1784 = vset.pattern.permute.xlu2 %v1815_v3  ;;  %1783 = vset.pattern.permute.xlu1 %v1815_v3  ;;  %v37_v5 = vld [vmem:[%s2754_s0 + $0x78] sm:$0xff] }
   0x2   :  { %v110_v2 = vld [vmem:[%s2756_s2] sm:$0xff]  ;;  %v36_v4 = vld [vmem:[%s2754_s0 + $0x70] sm:$0xff]  ;;  %1782 = vset.pattern.permute.xlu0 %v1815_v3  ;;  %196 = vperm.xlu2 %1784, %v114_v0   ;;  %v35_v8 = vld [vmem:[%s2754_s0 + $0x68] sm:$0xff] }
   0x3   :  { %v45_v6 = vpack.c.bf16 %v37_v5, %v36_v4  ;;  %186 = vperm.xlu1 %1783, %v112_v1   ;;  %176 = vperm.xlu0 %1782, %v110_v2   ;;  %v34_v7 = vld [vmem:[%s2754_s0 + $0x60] sm:$0xff]  ;;  %v115_v11 = vld [vmem:[%s2756_s2 + $0x28] sm:$0xff]  ;;  %v113_v12 = vld [vmem:[%s2756_s2 + $0x18] sm:$0xff] }
   0x4   :  { %v44_v10 = vpack.c.bf16 %v35_v8, %v34_v7  ;;  %v111_v13 = vld [vmem:[%s2756_s2 + $0x8] sm:$0xff] }
   0x5   :  { %v773_v9 = vsel %vm654_vm0, %v45_v6, 0 }
   0x6   :  { %775 = vmatpush.bf16.xpose.msra.mxu0 %v773_v9  ;;  %1756 = vmatpush.bf16.xpose.msra.mxu1 %v773_v9 }
   0x7   :  { %1757 = vmatpush.bf16.xpose.msra.mxu2 %v773_v9  ;;  %1758 = vmatpush.bf16.xpose.msra.mxu3 %v773_v9 }
   0x8   :  { %11 = vsyncpa [#allocation4], 0  ;;  %v770_v14 = vsel %vm654_vm0, %v44_v10, 0  ;;  %v32_v15 = vld [vmem:[%s2754_s0 + $0x50] sm:$0xff]  ;;  %v33_v16 = vld [vmem:[%s2754_s0 + $0x58] sm:$0xff]  ;;  %s1816_s25 = smov [#allocation3]  }
   0x9   :  { %v43_v17 = vpack.c.bf16 %v33_v16, %v32_v15  ;;  %v118_v18 = vld [vmem:[%s2756_s2 + $0x40] sm:$0xff]  ;;  %v117_v19 = vld [vmem:[%s2756_s2 + $0x38] sm:$0xff]  ;;  %v116_v20 = vld [vmem:[%s2756_s2 + $0x30] sm:$0xff]  ;;  %s1553_s26 = sshll.u32 %s1816_s25, 4  ;;  %s1554_s26 = int_to_ptr.vmem [resolvable:$true] %s1553_s26 }
   0xa   :  { %201 = vperm.xlu2 %1784, %v115_v11   ;;  %v30_v22 = vld [vmem:[%s2754_s0 + $0x40] sm:$0xff]  ;;  %v31_v23 = vld [vmem:[%s2754_s0 + $0x48] sm:$0xff]  ;;  %v121_v25 = vld [vmem:[%s2756_s2 + $0x58] sm:$0xff] }
   0xb   :  { %191 = vperm.xlu1 %1783, %v113_v12   ;;  %181 = vperm.xlu0 %1782, %v111_v13   ;;  %v767_v21 = vsel %vm654_vm0, %v43_v17, 0  ;;  %v42_v24 = vpack.c.bf16 %v31_v23, %v30_v22  ;;  %v120_v26 = vld [vmem:[%s2756_s2 + $0x50] sm:$0xff]  ;;  %v119_v27 = vld [vmem:[%s2756_s2 + $0x48] sm:$0xff]  ;;  %v29_v30 = vld [vmem:[%s2754_s0 + $0x38] sm:$0xff] }
   0xc   :  { %v28_v29 = vld [vmem:[%s2754_s0 + $0x30] sm:$0xff]  ;;  %v123_v33 = vld [vmem:[%s2756_s2 + $0x68] sm:$0xff]  ;;  %v122_v34 = vld [vmem:[%s2756_s2 + $0x60] sm:$0xff] }
   0xd   :  { %v764_v28 = vsel %vm654_vm0, %v42_v24, 0  ;;  %v41_v31 = vpack.c.bf16 %v29_v30, %v28_v29  ;;  %v124_v32 = vld [vmem:[%s2756_s2 + $0x70] sm:$0xff]  ;;  %v26_v36 = vld [vmem:[%s2754_s0 + $0x20] sm:$0xff]  ;;  %v27_v37 = vld [vmem:[%s2754_s0 + $0x28] sm:$0xff] }
   0xe   :  { %776 = vmatpush.bf16.xpose.msra.mxu0 %v770_v14  ;;  %1759 = vmatpush.bf16.xpose.msra.mxu1 %v770_v14  ;;  %v40_v38 = vpack.c.bf16 %v27_v37, %v26_v36  ;;  %v127_v39 = vld [vmem:[%s2756_s2 + $0x88] sm:$0xff]  ;;  %v126_v40 = vld [vmem:[%s2756_s2 + $0x80] sm:$0xff]  ;;  %v125_v41 = vld [vmem:[%s2756_s2 + $0x78] sm:$0xff] }
   0xf   :  { %1760 = vmatpush.bf16.xpose.msra.mxu2 %v770_v14  ;;  %1761 = vmatpush.bf16.xpose.msra.mxu3 %v770_v14  ;;  %v761_v35 = vsel %vm654_vm0, %v41_v31, 0  ;;  %v24_v43 = vld [vmem:[%s2754_s0 + $0x10] sm:$0xff]  ;;  %v25_v44 = vld [vmem:[%s2754_s0 + $0x18] sm:$0xff]  ;;  %v130_v46 = vld [vmem:[%s2756_s2 + $0xa0] sm:$0xff] }
  0x10   :  { %v758_v42 = vsel %vm654_vm0, %v40_v38, 0  ;;  %v39_v45 = vpack.c.bf16 %v25_v44, %v24_v43  ;;  %v129_v47 = vld [vmem:[%s2756_s2 + $0x98] sm:$0xff]  ;;  %v128_v48 = vld [vmem:[%s2756_s2 + $0x90] sm:$0xff]  ;;  %v22_v50 = vld [vmem:[%s2754_s0] sm:$0xff] }
  0x11   :  { %v23_v51 = vld [vmem:[%s2754_s0 + $0x8] sm:$0xff]  ;;  %v133_v53 = vld [vmem:[%s2756_s2 + $0xb8] sm:$0xff]  ;;  %v132_v54 = vld [vmem:[%s2756_s2 + $0xb0] sm:$0xff] }
  0x12   :  { %216 = vperm.xlu2 %1784, %v118_v18   ;;  %v755_v49 = vsel %vm654_vm0, %v39_v45, 0  ;;  %v38_v52 = vpack.c.bf16 %v23_v51, %v22_v50  ;;  %v131_v55 = vld [vmem:[%s2756_s2 + $0xa8] sm:$0xff]  ;;  %v136_v57 = vld [vmem:[%s2756_s2 + $0xd0] sm:$0xff]  ;;  %v134_v59 = vld [vmem:[%s2756_s2 + $0xc0] sm:$0xff] }
  0x13   :  { %211 = vperm.xlu1 %1783, %v117_v19   ;;  %206 = vperm.xlu0 %1782, %v116_v20   ;;  %v135_v58 = vld [vmem:[%s2756_s2 + $0xc8] sm:$0xff]  ;;  %v1724_v60 = vld [vmem:[%s2755_s1] sm:$0xff]  ;;  %v137_v2 = vld [vmem:[%s2756_s2 + $0xd8] sm:$0xff] }
  0x14   :  { %v752_v56 = vsel %vm654_vm0, %v38_v52, 0  ;;  %v1732_v61 = vld [vmem:[%s2755_s1 + $0x40] sm:$0xff]  ;;  %v139_v0 = vld [vmem:[%s2756_s2 + $0xe8] sm:$0xff]  ;;  %v141_v4 = vld [vmem:[%s2756_s2 + $0xf8] sm:$0xff] }
  0x15   :  { %v1740_v62 = vld [vmem:[%s2755_s1 + $0x80] sm:$0xff]  ;;  %v140_v5 = vld [vmem:[%s2756_s2 + $0xf0] sm:$0xff]  ;;  %v1725_v6 = vld [vmem:[%s2755_s1 + $0x8] sm:$0xff] }
  0x16   :  { %777 = vmatpush.bf16.xpose.msra.mxu0 %v767_v21  ;;  %1762 = vmatpush.bf16.xpose.msra.mxu1 %v767_v21  ;;  %v1748_v63 = vld [vmem:[%s2755_s1 + $0xc0] sm:$0xff]  ;;  %v1733_v7 = vld [vmem:[%s2755_s1 + $0x48] sm:$0xff]  ;;  %v145_v10 = vld [vmem:[%s2756_s2 + $0x118] sm:$0xff] }
  0x17   :  { %1763 = vmatpush.bf16.xpose.msra.mxu2 %v767_v21  ;;  %1764 = vmatpush.bf16.xpose.msra.mxu3 %v767_v21  ;;  %v138_v1 = vld [vmem:[%s2756_s2 + $0xe0] sm:$0xff]  ;;  %v1741_v8 = vld [vmem:[%s2755_s1 + $0x88] sm:$0xff]  ;;  %v144_v11 = vld [vmem:[%s2756_s2 + $0x110] sm:$0xff] }
  0x18   :  { %v142_v3 = vld [vmem:[%s2756_s2 + $0x100] sm:$0xff]  ;;  %v1749_v9 = vld [vmem:[%s2755_s1 + $0xc8] sm:$0xff]  ;;  %v148_v14 = vld [vmem:[%s2756_s2 + $0x130] sm:$0xff] }
  0x19   :  { %v143_v12 = vld [vmem:[%s2756_s2 + $0x108] sm:$0xff]  ;;  %v146_v16 = vld [vmem:[%s2756_s2 + $0x120] sm:$0xff]  ;;  %v1726_v17 = vld [vmem:[%s2755_s1 + $0x10] sm:$0xff] }
  0x1a   :  { %231 = vperm.xlu2 %1784, %v121_v25   ;;  %v147_v15 = vld [vmem:[%s2756_s2 + $0x128] sm:$0xff]  ;;  %v1734_v18 = vld [vmem:[%s2755_s1 + $0x50] sm:$0xff]  ;;  %v150_v23 = vld [vmem:[%s2756_s2 + $0x140] sm:$0xff] }
  0x1b   :  { %226 = vperm.xlu1 %1783, %v120_v26   ;;  %221 = vperm.xlu0 %1782, %v119_v27   ;;  %v1742_v19 = vld [vmem:[%s2755_s1 + $0x90] sm:$0xff]  ;;  %v151_v22 = vld [vmem:[%s2756_s2 + $0x148] sm:$0xff]  ;;  %v149_v24 = vld [vmem:[%s2756_s2 + $0x138] sm:$0xff] }
  0x1c   :  { %v1750_v20 = vld [vmem:[%s2755_s1 + $0xd0] sm:$0xff]  ;;  %v154_v26 = vld [vmem:[%s2756_s2 + $0x160] sm:$0xff]  ;;  %v153_v27 = vld [vmem:[%s2756_s2 + $0x158] sm:$0xff] }
  0x1d   :  { %v1727_v29 = vld [vmem:[%s2755_s1 + $0x18] sm:$0xff]  ;;  %v156_v37 = vld [vmem:[%s2756_s2 + $0x170] sm:$0xff]  ;;  %v155_v38 = vld [vmem:[%s2756_s2 + $0x168] sm:$0xff] }
  0x1e   :  { %778 = vmatpush.bf16.xpose.msra.mxu0 %v764_v28  ;;  %1765 = vmatpush.bf16.xpose.msra.mxu1 %v764_v28  ;;  %v1735_v30 = vld [vmem:[%s2755_s1 + $0x58] sm:$0xff]  ;;  %v159_v43 = vld [vmem:[%s2756_s2 + $0x188] sm:$0xff]  ;;  %v158_v44 = vld [vmem:[%s2756_s2 + $0x180] sm:$0xff] }
  0x1f   :  { %1766 = vmatpush.bf16.xpose.msra.mxu2 %v764_v28  ;;  %1767 = vmatpush.bf16.xpose.msra.mxu3 %v764_v28  ;;  %v152_v28 = vld [vmem:[%s2756_s2 + $0x150] sm:$0xff]  ;;  %v1743_v31 = vld [vmem:[%s2755_s1 + $0x98] sm:$0xff]  ;;  %v1728_v45 = vld [vmem:[%s2755_s1 + $0x20] sm:$0xff] }
  0x20   :  { %v157_v36 = vld [vmem:[%s2756_s2 + $0x178] sm:$0xff]  ;;  %v163_v52 = vld [vmem:[%s2756_s2 + $0x1a8] sm:$0xff] }
  0x22   :  { %246 = vperm.xlu2 %1784, %v124_v32   ;;  %v1751_v32 = vld [vmem:[%s2755_s1 + $0xd8] sm:$0xff] }
  0x23   :  { %241 = vperm.xlu1 %1783, %v123_v33   ;;  %236 = vperm.xlu0 %1782, %v122_v34  }
  0x26   :  { %779 = vmatpush.bf16.xpose.msra.mxu0 %v761_v35  ;;  %1768 = vmatpush.bf16.xpose.msra.mxu1 %v761_v35 }
  0x27   :  { %1769 = vmatpush.bf16.xpose.msra.mxu2 %v761_v35  ;;  %1770 = vmatpush.bf16.xpose.msra.mxu3 %v761_v35 }
  0x2a   :  { %261 = vperm.xlu2 %1784, %v127_v39  }
  0x2b   :  { %256 = vperm.xlu1 %1783, %v126_v40   ;;  %251 = vperm.xlu0 %1782, %v125_v41  }
  0x2e   :  { %780 = vmatpush.bf16.xpose.msra.mxu0 %v758_v42  ;;  %1771 = vmatpush.bf16.xpose.msra.mxu1 %v758_v42 }
  0x2f   :  { %1772 = vmatpush.bf16.xpose.msra.mxu2 %v758_v42  ;;  %1773 = vmatpush.bf16.xpose.msra.mxu3 %v758_v42  ;;  %v160_v42 = vld [vmem:[%s2756_s2 + $0x190] sm:$0xff] }
  0x32   :  { %276 = vperm.xlu2 %1784, %v130_v46   ;;  %v1736_v46 = vld [vmem:[%s2755_s1 + $0x60] sm:$0xff] }
  0x33   :  { %271 = vperm.xlu1 %1783, %v129_v47   ;;  %266 = vperm.xlu0 %1782, %v128_v48   ;;  %v1744_v47 = vld [vmem:[%s2755_s1 + $0xa0] sm:$0xff] }
  0x34   :  { %v1752_v48 = vld [vmem:[%s2755_s1 + $0xe0] sm:$0xff] }
  0x36   :  { %781 = vmatpush.bf16.xpose.msra.mxu0 %v755_v49  ;;  %1774 = vmatpush.bf16.xpose.msra.mxu1 %v755_v49 }
  0x37   :  { %1775 = vmatpush.bf16.xpose.msra.mxu2 %v755_v49  ;;  %1776 = vmatpush.bf16.xpose.msra.mxu3 %v755_v49 }
  0x3a   :  { %291 = vperm.xlu2 %1784, %v133_v53   ;;  %v162_v53 = vld [vmem:[%s2756_s2 + $0x1a0] sm:$0xff] }
  0x3b   :  { %286 = vperm.xlu1 %1783, %v132_v54   ;;  %281 = vperm.xlu0 %1782, %v131_v55   ;;  %v161_v54 = vld [vmem:[%s2756_s2 + $0x198] sm:$0xff] }
  0x3e   :  { %782 = vmatpush.bf16.xpose.msra.mxu0 %v752_v56  ;;  %1777 = vmatpush.bf16.xpose.msra.mxu1 %v752_v56 }
  0x3f   :  { %1778 = vmatpush.bf16.xpose.msra.mxu2 %v752_v56  ;;  %1779 = vmatpush.bf16.xpose.msra.mxu3 %v752_v56 }
  0x42   :  { %306 = vperm.xlu2 %1784, %v136_v57  }
  0x43   :  { %301 = vperm.xlu1 %1783, %v135_v58   ;;  %296 = vperm.xlu0 %1782, %v134_v59   ;;  %v166_v58 = vld [vmem:[%s2756_s2 + $0x1c0] sm:$0xff]  ;;  %v165_v59 = vld [vmem:[%s2756_s2 + $0x1b8] sm:$0xff] }
  0x45   :  { %1692 = vmatmul.msk.bf16.vlgmr.msra.gmra.mxu0 %vm654_vm0, %v1724_v60  ;;  %1700 = vmatmul.msk.bf16.vlgmr.msra.gmra.mxu1 %vm654_vm0, %v1732_v61  ;;  %v164_v60 = vld [vmem:[%s2756_s2 + $0x1b0] sm:$0xff]  ;;  %v1729_v61 = vld [vmem:[%s2755_s1 + $0x28] sm:$0xff] }
  0x46   :  { %1708 = vmatmul.msk.bf16.vlgmr.msra.gmra.mxu2 %vm654_vm0, %v1740_v62  ;;  %1716 = vmatmul.msk.bf16.vlgmr.msra.gmra.mxu3 %vm654_vm0, %v1748_v63  ;;  %v1737_v62 = vld [vmem:[%s2755_s1 + $0x68] sm:$0xff] }
  0x47   :  { %v1745_v63 = vld [vmem:[%s2755_s1 + $0xa8] sm:$0xff] }
  0x4a   :  { %321 = vperm.xlu2 %1784, %v139_v0   ;;  %v1753_v0 = vld [vmem:[%s2755_s1 + $0xe8] sm:$0xff] }
  0x4b   :  { %316 = vperm.xlu1 %1783, %v138_v1   ;;  %311 = vperm.xlu0 %1782, %v137_v2  }
  0x52   :  { %336 = vperm.xlu2 %1784, %v142_v3  }
  0x53   :  { %331 = vperm.xlu1 %1783, %v141_v4   ;;  %326 = vperm.xlu0 %1782, %v140_v5   ;;  %v169_v4 = vld [vmem:[%s2756_s2 + $0x1d8] sm:$0xff]  ;;  %v168_v5 = vld [vmem:[%s2756_s2 + $0x1d0] sm:$0xff] }
  0x55   :  { %1693 = vmatmul.msk.bf16.gmra.mxu0 %vm654_vm0, %v1725_v6  ;;  %1701 = vmatmul.msk.bf16.gmra.mxu1 %vm654_vm0, %v1733_v7  ;;  %v167_v6 = vld [vmem:[%s2756_s2 + $0x1c8] sm:$0xff] }
  0x56   :  { %1709 = vmatmul.msk.bf16.gmra.mxu2 %vm654_vm0, %v1741_v8  ;;  %1717 = vmatmul.msk.bf16.gmra.mxu3 %vm654_vm0, %v1749_v9 }
  0x5a   :  { %351 = vperm.xlu2 %1784, %v145_v10   ;;  %v172_v10 = vld [vmem:[%s2756_s2 + $0x1f0] sm:$0xff] }
  0x5b   :  { %346 = vperm.xlu1 %1783, %v144_v11   ;;  %341 = vperm.xlu0 %1782, %v143_v12   ;;  %v171_v11 = vld [vmem:[%s2756_s2 + $0x1e8] sm:$0xff]  ;;  %v170_v12 = vld [vmem:[%s2756_s2 + $0x1e0] sm:$0xff] }
  0x5c   :  { %v2043_v13 = vpop.permute.xlu2 %196 }
  0x62   :  { %366 = vperm.xlu2 %1784, %v148_v14   ;;  %v1730_v14 = vld [vmem:[%s2755_s1 + $0x30] sm:$0xff] }
  0x63   :  { %361 = vperm.xlu1 %1783, %v147_v15   ;;  %356 = vperm.xlu0 %1782, %v146_v16   ;;  %v1738_v15 = vld [vmem:[%s2755_s1 + $0x70] sm:$0xff] }
  0x64   :  { %v2068_v21 = vpop.permute.xlu2 %201  ;;  %v1746_v16 = vld [vmem:[%s2755_s1 + $0xb0] sm:$0xff] }
  0x65   :  { %1694 = vmatmul.msk.bf16.gmra.mxu0 %vm654_vm0, %v1726_v17  ;;  %1702 = vmatmul.msk.bf16.gmra.mxu1 %vm654_vm0, %v1734_v18  ;;  %v1754_v17 = vld [vmem:[%s2755_s1 + $0xf0] sm:$0xff] }
  0x66   :  { %1710 = vmatmul.msk.bf16.gmra.mxu2 %vm654_vm0, %v1742_v19  ;;  %1718 = vmatmul.msk.bf16.gmra.mxu3 %vm654_vm0, %v1750_v20 }
  0x6a   :  { %381 = vperm.xlu2 %1784, %v151_v22   ;;  %v1009_v22 = vld [vmem:[%s2757_s3 + $0x8] sm:$0xff] }
  0x6b   :  { %376 = vperm.xlu1 %1783, %v150_v23   ;;  %371 = vperm.xlu0 %1782, %v149_v24   ;;  %v1008_v23 = vld [vmem:[%s2757_s3] sm:$0xff]  ;;  %v173_v24 = vld [vmem:[%s2756_s2 + $0x1f8] sm:$0xff] }
  0x6c   :  { %v2081_v25 = vpop.permute.xlu2 %216 }
  0x72   :  { %396 = vperm.xlu2 %1784, %v154_v26  }
  0x73   :  { %391 = vperm.xlu1 %1783, %v153_v27   ;;  %386 = vperm.xlu0 %1782, %v152_v28  }
  0x74   :  { %v2106_v33 = vpop.permute.xlu2 %231 }
  0x75   :  { %1695 = vmatmul.msk.bf16.gmra.mxu0 %vm654_vm0, %v1727_v29  ;;  %1703 = vmatmul.msk.bf16.gmra.mxu1 %vm654_vm0, %v1735_v30  ;;  %v2110_v34 = vpop.permute.xlu1 %186  ;;  %v2112_v35 = vpop.permute.xlu0 %176  ;;  %v1012_v29 = vld [vmem:[%s2757_s3 + $0x20] sm:$0xff]  ;;  %v1011_v30 = vld [vmem:[%s2757_s3 + $0x18] sm:$0xff] }
  0x76   :  { %1711 = vmatmul.msk.bf16.gmra.mxu2 %vm654_vm0, %v1743_v31  ;;  %1719 = vmatmul.msk.bf16.gmra.mxu3 %vm654_vm0, %v1751_v32  ;;  %v1010_v31 = vld [vmem:[%s2757_s3 + $0x10] sm:$0xff]  ;;  %v1731_v32 = vld [vmem:[%s2755_s1 + $0x38] sm:$0xff] }
  0x7a   :  { %411 = vperm.xlu2 %1784, %v157_v36   ;;  %v1739_v36 = vld [vmem:[%s2755_s1 + $0x78] sm:$0xff] }
  0x7b   :  { %406 = vperm.xlu1 %1783, %v156_v37   ;;  %401 = vperm.xlu0 %1782, %v155_v38   ;;  %v1747_v37 = vld [vmem:[%s2755_s1 + $0xb8] sm:$0xff] }
  0x7c   :  { %v2123_v39 = vpop.permute.xlu2 %246  ;;  %v1755_v38 = vld [vmem:[%s2755_s1 + $0xf8] sm:$0xff] }
  0x7d   :  { %v2125_v40 = vpop.permute.xlu1 %191  ;;  %v2127_v41 = vpop.permute.xlu0 %181 }
  0x82   :  { %426 = vperm.xlu2 %1784, %v160_v42  }
  0x83   :  { %421 = vperm.xlu1 %1783, %v159_v43   ;;  %416 = vperm.xlu0 %1782, %v158_v44  }
  0x84   :  { %v2152_v49 = vpop.permute.xlu2 %261 }
  0x85   :  { %1696 = vmatmul.msk.bf16.gmra.mxu0 %vm654_vm0, %v1728_v45  ;;  %1704 = vmatmul.msk.bf16.gmra.mxu1 %vm654_vm0, %v1736_v46  ;;  %v2156_v50 = vpop.permute.xlu1 %211  ;;  %v2158_v51 = vpop.permute.xlu0 %206  ;;  %v1015_v45 = vld [vmem:[%s2757_s3 + $0x38] sm:$0xff]  ;;  %v1014_v46 = vld [vmem:[%s2757_s3 + $0x30] sm:$0xff] }
  0x86   :  { %1712 = vmatmul.msk.bf16.gmra.mxu2 %vm654_vm0, %v1744_v47  ;;  %1720 = vmatmul.msk.bf16.gmra.mxu3 %vm654_vm0, %v1752_v48  ;;  %v1013_v47 = vld [vmem:[%s2757_s3 + $0x28] sm:$0xff] }
  0x8a   :  { %441 = vperm.xlu2 %1784, %v163_v52  }
  0x8b   :  { %436 = vperm.xlu1 %1783, %v162_v53   ;;  %431 = vperm.xlu0 %1782, %v161_v54   ;;  %v1018_v54 = vld [vmem:[%s2757_s3 + $0x50] sm:$0xff] }
  0x8c   :  { %v2169_v55 = vpop.permute.xlu2 %276 }
  0x8d   :  { %v2171_v56 = vpop.permute.xlu1 %226  ;;  %v2173_v57 = vpop.permute.xlu0 %221 }
  0x92   :  { %456 = vperm.xlu2 %1784, %v166_v58   ;;  %v1017_v58 = vld [vmem:[%s2757_s3 + $0x48] sm:$0xff] }
  0x93   :  { %451 = vperm.xlu1 %1783, %v165_v59   ;;  %446 = vperm.xlu0 %1782, %v164_v60   ;;  %v1016_v59 = vld [vmem:[%s2757_s3 + $0x40] sm:$0xff] }
  0x94   :  { %v2198_v1 = vpop.permute.xlu2 %291 }
  0x95   :  { %1697 = vmatmul.msk.bf16.gmra.mxu0 %vm654_vm0, %v1729_v61  ;;  %1705 = vmatmul.msk.bf16.gmra.mxu1 %vm654_vm0, %v1737_v62  ;;  %v2202_v2 = vpop.permute.xlu1 %241  ;;  %v2204_v3 = vpop.permute.xlu0 %236 }
  0x96   :  { %1713 = vmatmul.msk.bf16.gmra.mxu2 %vm654_vm0, %v1745_v63  ;;  %1721 = vmatmul.msk.bf16.gmra.mxu3 %vm654_vm0, %v1753_v0 }
  0x9a   :  { %471 = vperm.xlu2 %1784, %v169_v4  }
  0x9b   :  { %466 = vperm.xlu1 %1783, %v168_v5   ;;  %461 = vperm.xlu0 %1782, %v167_v6   ;;  %v1021_v5 = vld [vmem:[%s2757_s3 + $0x68] sm:$0xff] }
  0x9c   :  { %v2215_v7 = vpop.permute.xlu2 %306 }
  0x9d   :  { %v257_v8 = vpop.permute.xlu1 %256  ;;  %v2217_v9 = vpop.permute.xlu0 %251 }
  0xa2   :  { %486 = vperm.xlu2 %1784, %v172_v10  }
  0xa3   :  { %481 = vperm.xlu1 %1783, %v171_v11   ;;  %476 = vperm.xlu0 %1782, %v170_v12   ;;  %v1019_v11 = vld [vmem:[%s2757_s3 + $0x58] sm:$0xff] }
  0xa4   :  { %v2242_v18 = vpop.permute.xlu2 %321 }
  0xa5   :  { %1698 = vmatmul.msk.bf16.gmra.mxu0 %vm654_vm0, %v1730_v14  ;;  %1706 = vmatmul.msk.bf16.gmra.mxu1 %vm654_vm0, %v1738_v15  ;;  %v2246_v19 = vpop.permute.xlu1 %271  ;;  %v2248_v20 = vpop.permute.xlu0 %266 }
  0xa6   :  { %1714 = vmatmul.msk.bf16.gmra.mxu2 %vm654_vm0, %v1746_v16  ;;  %1722 = vmatmul.msk.bf16.gmra.mxu3 %vm654_vm0, %v1754_v17 }
  0xaa   :  { %1079 = vperm.xlu2 %1784, %v1009_v22  }
  0xab   :  { %1074 = vperm.xlu1 %1783, %v1008_v23   ;;  %491 = vperm.xlu0 %1782, %v173_v24   ;;  %v1024_v24 = vld [vmem:[%s2757_s3 + $0x80] sm:$0xff] }
  0xac   :  { %v337_v26 = vpop.permute.xlu2 %336 }
  0xad   :  { %v2259_v27 = vpop.permute.xlu1 %286  ;;  %v2261_v28 = vpop.permute.xlu0 %281 }
  0xb2   :  { %1094 = vperm.xlu2 %1784, %v1012_v29  }
  0xb3   :  { %1089 = vperm.xlu1 %1783, %v1011_v30   ;;  %1084 = vperm.xlu0 %1782, %v1010_v31  }
  0xb4   :  { %v2286_v42 = vpop.permute.xlu2 %351 }
  0xb5   :  { %1699 = vmatmul.msk.bf16.gmra.mxu0 %vm654_vm0, %v1731_v32  ;;  %1707 = vmatmul.msk.bf16.gmra.mxu1 %vm654_vm0, %v1739_v36  ;;  %v2290_v43 = vpop.permute.xlu1 %301  ;;  %v2292_v44 = vpop.permute.xlu0 %296 }
  0xb6   :  { %1715 = vmatmul.msk.bf16.gmra.mxu2 %vm654_vm0, %v1747_v37  ;;  %1723 = vmatmul.msk.bf16.gmra.mxu3 %vm654_vm0, %v1755_v38 }
  0xba   :  { %1109 = vperm.xlu2 %1784, %v1015_v45  }
  0xbb   :  { %1104 = vperm.xlu1 %1783, %v1014_v46   ;;  %1099 = vperm.xlu0 %1782, %v1013_v47   ;;  %v1027_v47 = vld [vmem:[%s2757_s3 + $0x98] sm:$0xff] }
  0xbc   :  { %v2303_v48 = vpop.permute.xlu2 %366 }
  0xbd   :  { %2760 = vst [vmem:[#allocation6_spill] sm:$0xff] %v2303_v48  ;;  %v2305_v52 = vpop.permute.xlu1 %316  ;;  %v2307_v53 = vpop.permute.xlu0 %311 }
  0xc2   :  { %v2318_v60 = vpop.f32.mrf.mxu0  ;;  %v824_v61 = vpop.f32.mrf.mxu1  ;;  %1124 = vperm.xlu2 %1784, %v1018_v54  }
  0xc3   :  { %v2320_v62 = vadd.f32 %v824_v61, %v257_v8  ;;  %1119 = vperm.xlu1 %1783, %v1017_v58   ;;  %1114 = vperm.xlu0 %1782, %v1016_v59   ;;  %v1020_v8 = vld [vmem:[%s2757_s3 + $0x60] sm:$0xff]  ;;  %v1026_v58 = vld [vmem:[%s2757_s3 + $0x90] sm:$0xff] }
  0xc4   :  { %v2322_v63 = vpop.permute.xlu2 %381 }
  0xc5   :  { %2761 = vst [vmem:[#allocation7_spill] sm:$0xff] %v2322_v63  ;;  %v2324_v0 = vpop.permute.xlu1 %331  ;;  %v2326_v4 = vpop.permute.xlu0 %326  ;;  %v1051_v63 = vld [vmem:[%s2757_s3 + $0x158] sm:$0xff] }
  0xc9   :  { %v864_v6 = vpop.f32.mrf.mxu2  ;;  %v2331_v10 = vpop.f32.mrf.mxu3 }
  0xca   :  { %v2339_v12 = vadd.f32 %v864_v6, %v337_v26  ;;  %v2341_v14 = vpop.f32.mrf.mxu0  ;;  %v826_v15 = vpop.f32.mrf.mxu1  ;;  %1139 = vperm.xlu2 %1784, %v1021_v5   ;;  %v1023_v26 = vld [vmem:[%s2757_s3 + $0x78] sm:$0xff] }
  0xcb   :  { %v2344_v16 = vadd.f32 %v826_v15, %v2152_v49  ;;  %1134 = vperm.xlu1 %1783, %v1020_v8   ;;  %1129 = vperm.xlu0 %1782, %v1019_v11   ;;  %v1022_v49 = vld [vmem:[%s2757_s3 + $0x70] sm:$0xff] }
  0xcc   :  { %v2346_v17 = vpop.permute.xlu2 %396 }
  0xcd   :  { %2762 = vst [vmem:[#allocation8_spill] sm:$0xff] %v2346_v17  ;;  %v347_v22 = vpop.permute.xlu1 %346  ;;  %v342_v23 = vpop.permute.xlu0 %341  ;;  %v1038_v17 = vld [vmem:[%s2757_s3 + $0xf0] sm:$0xff] }
  0xd1   :  { %v866_v29 = vpop.f32.mrf.mxu2  ;;  %v906_v36 = vpop.f32.mrf.mxu3 }
  0xd2   :  { %v2357_v30 = vadd.f32 %v866_v29, %v342_v23  ;;  %v2359_v31 = vpop.f32.mrf.mxu0  ;;  %v829_v32 = vpop.f32.mrf.mxu1  ;;  %1154 = vperm.xlu2 %1784, %v1024_v24  }
  0xd3   :  { %v2362_v37 = vadd.f32 %v829_v32, %v2248_v20  ;;  %1149 = vperm.xlu1 %1783, %v1023_v26   ;;  %1144 = vperm.xlu0 %1782, %v1022_v49   ;;  %v1025_v20 = vld [vmem:[%s2757_s3 + $0x88] sm:$0xff]  ;;  %v1028_v26 = vld [vmem:[%s2757_s3 + $0xa0] sm:$0xff] }
  0xd4   :  { %v2364_v38 = vpop.permute.xlu2 %411 }
  0xd5   :  { %2763 = vst [vmem:[#allocation9_spill] sm:$0xff] %v2364_v38  ;;  %v2366_v45 = vpop.permute.xlu1 %361  ;;  %v357_v46 = vpop.permute.xlu0 %356 }
  0xd6   :  { %2764 = vst [vmem:[#allocation10_spill] sm:$0xff] %v2366_v45  ;;  %v1054_v45 = vld [vmem:[%s2757_s3 + $0x170] sm:$0xff] }
  0xd9   :  { %v869_v54 = vpop.f32.mrf.mxu2  ;;  %v909_v8 = vpop.f32.mrf.mxu3 }
  0xda   :  { %v2377_v59 = vadd.f32 %v869_v54, %v347_v22  ;;  %v2379_v61 = vpop.f32.mrf.mxu0  ;;  %v831_v5 = vpop.f32.mrf.mxu1  ;;  %1169 = vperm.xlu2 %1784, %v1027_v47   ;;  %v1030_v22 = vld [vmem:[%s2757_s3 + $0xb0] sm:$0xff] }
  0xdb   :  { %v2382_v6 = vadd.f32 %v831_v5, %v2246_v19  ;;  %1164 = vperm.xlu1 %1783, %v1026_v58   ;;  %1159 = vperm.xlu0 %1782, %v1025_v20   ;;  %v1029_v19 = vld [vmem:[%s2757_s3 + $0xa8] sm:$0xff] }
  0xdc   :  { %2765 = vst [vmem:[#allocation11_spill] sm:$0xff] %v2377_v59  ;;  %v427_v11 = vpop.permute.xlu2 %426  ;;  %v1033_v20 = vld [vmem:[%s2757_s3 + $0xc8] sm:$0xff] }
  0xdd   :  { %v2384_v15 = vadd.f32 %v909_v8, %v427_v11  ;;  %v2386_v23 = vpop.permute.xlu1 %376  ;;  %v2388_v24 = vpop.permute.xlu0 %371  ;;  %v1031_v8 = vld [vmem:[%s2757_s3 + $0xb8] sm:$0xff] }
  0xde   :  { %2767 = vst [vmem:[#allocation13_spill] sm:$0xff] %v2386_v23  ;;  %v785_v23 = vadd.f32 %v2318_v60, %v2112_v35 }
  0xdf   :  { %2766 = vst [vmem:[#allocation12_spill] sm:$0xff] %v2384_v15 }
  0xe0   :  { %2768 = vst [vmem:[#allocation14_spill] sm:$0xff] %v2388_v24  ;;  %v787_v24 = vadd.f32 %v2341_v14, %v2127_v41 }
  0xe1   :  { %v871_v29 = vpop.f32.mrf.mxu2 }
  0xe2   :  { %v2400_v49 = vadd.f32 %v871_v29, %v2286_v42  ;;  %v2402_v32 = vpop.f32.mrf.mxu0  ;;  %1184 = vperm.xlu2 %1784, %v1030_v22   ;;  %v1032_v42 = vld [vmem:[%s2757_s3 + $0xc0] sm:$0xff]  ;;  %v945_v35 = vmax.f32 %v787_v24, 0.0 }
  0xe3   :  { %1179 = vperm.xlu1 %1783, %v1029_v19   ;;  %1174 = vperm.xlu0 %1782, %v1028_v26  }
  0xe4   :  { %2769 = vst [vmem:[#allocation15_spill] sm:$0xff] %v2400_v49  ;;  %v2404_v47 = vpop.permute.xlu2 %441  ;;  %v790_v49 = vadd.f32 %v2359_v31, %v2110_v34  ;;  %v795_v34 = vadd.f32 %v2402_v32, %v2043_v13  ;;  %v1056_v13 = vld [vmem:[%s2757_s3 + $0x180] sm:$0xff]  ;;  %v1055_v32 = vld [vmem:[%s2757_s3 + $0x178] sm:$0xff] }
  0xe5   :  { %2770 = vst [vmem:[#allocation16_spill] sm:$0xff] %v2404_v47  ;;  %v2406_v54 = vpop.permute.xlu1 %391  ;;  %v2408_v58 = vpop.permute.xlu0 %386  ;;  %v1036_v47 = vld [vmem:[%s2757_s3 + $0xe0] sm:$0xff] }
  0xe6   :  { %2771 = vst [vmem:[#allocation17_spill] sm:$0xff] %v2406_v54 }
  0xe7   :  { %2772 = vst [vmem:[#allocation18_spill] sm:$0xff] %v2408_v58  ;;  %v1047_v58 = vld [vmem:[%s2757_s3 + $0x138] sm:$0xff] }
  0xe9   :  { %v874_v5 = vpop.f32.mrf.mxu2 }
  0xea   :  { %v2419_v11 = vadd.f32 %v874_v5, %v357_v46  ;;  %v2421_v22 = vpop.f32.mrf.mxu0  ;;  %1199 = vperm.xlu2 %1784, %v1033_v20   ;;  %v1035_v46 = vld [vmem:[%s2757_s3 + $0xd8] sm:$0xff]  ;;  %v1034_v20 = vld [vmem:[%s2757_s3 + $0xd0] sm:$0xff] }
  0xeb   :  { %1194 = vperm.xlu1 %1783, %v1032_v42   ;;  %1189 = vperm.xlu0 %1782, %v1031_v8   ;;  %v911_v42 = vpop.f32.mrf.mxu3 }
  0xec   :  { %2773 = vst [vmem:[#allocation19_spill] sm:$0xff] %v2419_v11  ;;  %v2423_v29 = vpop.permute.xlu2 %456 }
  0xed   :  { %2774 = vst [vmem:[#allocation20_spill] sm:$0xff] %v2423_v29  ;;  %v2425_v19 = vpop.permute.xlu1 %406  ;;  %v2427_v26 = vpop.permute.xlu0 %401 }
  0xee   :  { %2775 = vst [vmem:[#allocation21_spill] sm:$0xff] %v2425_v19 }
  0xef   :  { %2776 = vst [vmem:[#allocation22_spill] sm:$0xff] %v2427_v26  ;;  %v1039_v26 = vld [vmem:[%s2757_s3 + $0xf8] sm:$0xff] }
  0xf2   :  { %v2438_v5 = vpop.f32.mrf.mxu0  ;;  %1214 = vperm.xlu2 %1784, %v1036_v47   ;;  %v1037_v47 = vld [vmem:[%s2757_s3 + $0xe8] sm:$0xff] }
  0xf3   :  { %1209 = vperm.xlu1 %1783, %v1035_v46   ;;  %1204 = vperm.xlu0 %1782, %v1034_v20  }
  0xf4   :  { %v2440_v8 = vpop.permute.xlu2 %471 }
  0xf5   :  { %2777 = vst [vmem:[#allocation23_spill] sm:$0xff] %v2440_v8  ;;  %v422_v29 = vpop.permute.xlu1 %421  ;;  %v417_v15 = vpop.permute.xlu0 %416 }
  0xf6   :  { %v2442_v38 = vadd.f32 %v906_v36, %v422_v29  ;;  %v2445_v19 = vadd.f32 %v2331_v10, %v417_v15  ;;  %v2458_v36 = vpop.f32.mrf.mxu1  ;;  %v914_v10 = vpop.f32.mrf.mxu3 }
  0xf8   :  { %2778 = vst [vmem:[#allocation24_spill] sm:$0xff] %v2442_v38 }
  0xf9   :  { %2779 = vst [vmem:[#allocation25_spill] sm:$0xff] %v2445_v19  ;;  %v1042_v19 = vld [vmem:[%s2757_s3 + $0x110] sm:$0xff] }
  0xfa   :  { %v2456_v46 = vpop.f32.mrf.mxu0  ;;  %1229 = vperm.xlu2 %1784, %v1039_v26   ;;  %v1041_v26 = vld [vmem:[%s2757_s3 + $0x108] sm:$0xff] }
  0xfb   :  { %1224 = vperm.xlu1 %1783, %v1038_v17   ;;  %1219 = vperm.xlu0 %1782, %v1037_v47   ;;  %v1040_v17 = vld [vmem:[%s2757_s3 + $0x100] sm:$0xff] }
  0xfc   :  { %v2460_v15 = vpop.permute.xlu2 %486 }
  0xfd   :  { %2780 = vst [vmem:[#allocation26_spill] sm:$0xff] %v2460_v15  ;;  %v437_v29 = vpop.permute.xlu1 %436  ;;  %v432_v20 = vpop.permute.xlu0 %431  ;;  %v1045_v15 = vld [vmem:[%s2757_s3 + $0x128] sm:$0xff] }
  0xfe   :  { %v2462_v8 = vadd.f32 %v914_v10, %v437_v29  ;;  %v2464_v38 = vadd.f32 %v911_v42, %v432_v20  ;;  %v2481_v20 = vpop.f32.mrf.mxu1 }
 0x100   :  { %2781 = vst [vmem:[#allocation27_spill] sm:$0xff] %v2462_v8  ;;  %v1044_v8 = vld [vmem:[%s2757_s3 + $0x120] sm:$0xff] }
 0x101   :  { %2782 = vst [vmem:[#allocation28_spill] sm:$0xff] %v2464_v38  ;;  %v1048_v38 = vld [vmem:[%s2757_s3 + $0x140] sm:$0xff] }
 0x102   :  { %v2475_v47 = vpop.f32.mrf.mxu0  ;;  %1244 = vperm.xlu2 %1784, %v1042_v19   ;;  %v1043_v19 = vld [vmem:[%s2757_s3 + $0x118] sm:$0xff] }
 0x103   :  { %1239 = vperm.xlu1 %1783, %v1041_v26   ;;  %1234 = vperm.xlu0 %1782, %v1040_v17  }
 0x104   :  { %v1080_v10 = vpop.permute.xlu2 %1079 }
 0x105   :  { %v2477_v42 = vpop.permute.xlu1 %451  ;;  %v2479_v29 = vpop.permute.xlu0 %446  ;;  %v1393_v48 = vmul.f32 %v1080_v10, %v945_v35  ;;  %v792_v10 = vadd.f32 %v2379_v61, %v2125_v40  ;;  %v948_v40 = vmax.f32 %v795_v34, 0.0 }
 0x106   :  { %2783 = vst [vmem:[#allocation29_spill] sm:$0xff] %v2477_v42  ;;  %v2501_v54 = vpop.f32.mrf.mxu1 }
 0x107   :  { %2784 = vst [vmem:[#allocation30_spill] sm:$0xff] %v2479_v29 }
 0x10a   :  { %v2492_v26 = vpop.f32.mrf.mxu0  ;;  %1259 = vperm.xlu2 %1784, %v1045_v15  }
 0x10b   :  { %1254 = vperm.xlu1 %1783, %v1044_v8   ;;  %1249 = vperm.xlu0 %1782, %v1043_v19   ;;  %v1046_v8 = vld [vmem:[%s2757_s3 + $0x130] sm:$0xff] }
 0x10c   :  { %v1095_v17 = vpop.permute.xlu2 %1094 }
 0x10d   :  { %v2494_v42 = vpop.permute.xlu1 %466  ;;  %v2496_v29 = vpop.permute.xlu0 %461 }
 0x10e   :  { %2785 = vst [vmem:[#allocation31_spill] sm:$0xff] %v2494_v42 }
 0x10f   :  { %2786 = vst [vmem:[#allocation32_spill] sm:$0xff] %v2496_v29 }
 0x112   :  { %v2509_v15 = vpop.f32.mrf.mxu0  ;;  %1274 = vperm.xlu2 %1784, %v1048_v38   ;;  %v1050_v38 = vld [vmem:[%s2757_s3 + $0x150] sm:$0xff] }
 0x113   :  { %1269 = vperm.xlu1 %1783, %v1047_v58   ;;  %1264 = vperm.xlu0 %1782, %v1046_v8   ;;  %v1049_v58 = vld [vmem:[%s2757_s3 + $0x148] sm:$0xff] }
 0x114   :  { %v2511_v19 = vpop.permute.xlu2 %1109 }
 0x115   :  { %v2513_v42 = vpop.permute.xlu1 %481  ;;  %v2515_v29 = vpop.permute.xlu0 %476 }
 0x116   :  { %2787 = vst [vmem:[#allocation33_spill] sm:$0xff] %v2513_v42  ;;  %v2532_v42 = vpop.f32.mrf.mxu1 }
 0x117   :  { %2788 = vst [vmem:[#allocation34_spill] sm:$0xff] %v2515_v29  ;;  %v944_v29 = vmax.f32 %v785_v23, 0.0  ;;  %v1052_v23 = vld [vmem:[%s2757_s3 + $0x160] sm:$0xff] }
 0x11a   :  { %v2530_v8 = vpop.f32.mrf.mxu0  ;;  %1289 = vperm.xlu2 %1784, %v1051_v63   ;;  %v1053_v63 = vld [vmem:[%s2757_s3 + $0x168] sm:$0xff] }
 0x11b   :  { %1284 = vperm.xlu1 %1783, %v1050_v38   ;;  %1279 = vperm.xlu0 %1782, %v1049_v58   ;;  %v947_v58 = vmax.f32 %v792_v10, 0.0 }
 0x11c   :  { %v2534_v60 = vpop.permute.xlu2 %1124 }
 0x11d   :  { %v1075_v41 = vpop.permute.xlu1 %1074  ;;  %v2536_v14 = vpop.permute.xlu0 %491 }
 0x11e   :  { %2789 = vst [vmem:[#allocation35_spill] sm:$0xff] %v2536_v14  ;;  %v1392_v11 = vmul.f32 %v1075_v41, %v944_v29  ;;  %v946_v29 = vmax.f32 %v790_v49, 0.0  ;;  %v1057_v41 = vld [vmem:[%s2757_s3 + $0x188] sm:$0xff] }
 0x120   :  { %v1456_v59 = vadd.f32 %v1393_v48, %v1392_v11  ;;  %v2555_v48 = vpop.f32.mrf.mxu1 }
 0x122   :  { %v2549_v24 = vpop.f32.mrf.mxu0  ;;  %1304 = vperm.xlu2 %1784, %v1054_v45   ;;  %v797_v45 = vadd.f32 %v2421_v22, %v2068_v21 }
 0x123   :  { %1299 = vperm.xlu1 %1783, %v1053_v63   ;;  %1294 = vperm.xlu0 %1782, %v1052_v23   ;;  %v800_v63 = vadd.f32 %v2438_v5, %v2158_v51  ;;  %v1396_v23 = vmul.f32 %v1095_v17, %v948_v40  ;;  %v1060_v51 = vld [vmem:[%s2757_s3 + $0x1a0] sm:$0xff]  ;;  %v2581_v5 = vpop.f32.mrf.mxu2  ;;  %v805_v17 = vadd.f32 %v2475_v47, %v2081_v25 }
 0x124   :  { %v2557_v31 = vpop.permute.xlu2 %1139  ;;  %v949_v21 = vmax.f32 %v797_v45, 0.0  ;;  %v1059_v45 = vld [vmem:[%s2757_s3 + $0x198] sm:$0xff] }
 0x125   :  { %v1090_v11 = vpop.permute.xlu1 %1089  ;;  %v1085_v38 = vpop.permute.xlu0 %1084 }
 0x126   :  { %v1394_v35 = vmul.f32 %v1085_v38, %v946_v29  ;;  %v1395_v61 = vmul.f32 %v1090_v11, %v947_v58  ;;  %v950_v38 = vmax.f32 %v800_v63, 0.0  ;;  %v802_v58 = vadd.f32 %v2456_v46, %v2156_v50  ;;  %v1058_v50 = vld [vmem:[%s2757_s3 + $0x190] sm:$0xff] }
 0x128   :  { %v1457_v49 = vadd.f32 %v1456_v59, %v1394_v35  ;;  %v2576_v35 = vpop.f32.mrf.mxu1  ;;  %v951_v46 = vmax.f32 %v802_v58, 0.0 }
 0x12a   :  { %v1458_v10 = vadd.f32 %v1457_v49, %v1395_v61  ;;  %v816_v29 = vpop.f32.mrf.mxu0  ;;  %1319 = vperm.xlu2 %1784, %v1057_v41   ;;  %v807_v61 = vadd.f32 %v2492_v26, %v2173_v57  ;;  %v1399_v25 = vmul.f32 %v2511_v19, %v951_v46  ;;  %v1063_v57 = vld [vmem:[%s2757_s3 + $0x1b8] sm:$0xff]  ;;  %v812_v19 = vadd.f32 %v2530_v8, %v2106_v33 }
 0x12b   :  { %1314 = vperm.xlu1 %1783, %v1056_v13   ;;  %1309 = vperm.xlu0 %1782, %v1055_v32   ;;  %v952_v13 = vmax.f32 %v805_v17, 0.0 }
 0x12c   :  { %v2572_v22 = vpop.permute.xlu2 %1154  ;;  %v1459_v59 = vadd.f32 %v1458_v10, %v1396_v23  ;;  %v953_v23 = vmax.f32 %v807_v61, 0.0  ;;  %v810_v10 = vadd.f32 %v2509_v15, %v2171_v56  ;;  %v1061_v56 = vld [vmem:[%s2757_s3 + $0x1a8] sm:$0xff]  ;;  %v2611_v15 = vpop.f32.mrf.mxu2  ;;  %v955_v33 = vmax.f32 %v812_v19, 0.0 }
 0x12d   :  { %v1105_v34 = vpop.permute.xlu1 %1104  ;;  %v1100_v11 = vpop.permute.xlu0 %1099 }
 0x12e   :  { %v1397_v14 = vmul.f32 %v1100_v11, %v949_v21  ;;  %v1398_v41 = vmul.f32 %v1105_v34, %v950_v38  ;;  %v1062_v38 = vld [vmem:[%s2757_s3 + $0x1b0] sm:$0xff]  ;;  %v954_v58 = vmax.f32 %v810_v10, 0.0 }
 0x130   :  { %v1460_v40 = vadd.f32 %v1459_v59, %v1397_v14  ;;  %v2601_v26 = vpop.f32.mrf.mxu1  ;;  %v1402_v8 = vmul.f32 %v2534_v60, %v954_v58  ;;  %v1064_v60 = vld [vmem:[%s2757_s3 + $0x1c0] sm:$0xff] }
 0x132   :  { %v1461_v49 = vadd.f32 %v1460_v40, %v1398_v41  ;;  %1334 = vperm.xlu2 %1784, %v1060_v51   ;;  %v819_v47 = vpop.f32.mrf.mxu0  ;;  %v815_v51 = vadd.f32 %v2549_v24, %v2204_v3  ;;  %v817_v41 = vadd.f32 %v816_v29, %v2202_v2  ;;  %v1066_v3 = vld [vmem:[%s2757_s3 + $0x1d0] sm:$0xff]  ;;  %v1065_v2 = vld [vmem:[%s2757_s3 + $0x1c8] sm:$0xff] }
 0x133   :  { %1329 = vperm.xlu1 %1783, %v1059_v45   ;;  %1324 = vperm.xlu0 %1782, %v1058_v50  }
 0x134   :  { %v2594_v14 = vpop.permute.xlu2 %1169  ;;  %v1462_v59 = vadd.f32 %v1461_v49, %v1399_v25  ;;  %v956_v46 = vmax.f32 %v815_v51, 0.0  ;;  %v957_v24 = vmax.f32 %v817_v41, 0.0  ;;  %v820_v25 = vadd.f32 %v819_v47, %v2123_v39 }
 0x135   :  { %v1120_v32 = vpop.permute.xlu1 %1119  ;;  %v1115_v63 = vpop.permute.xlu0 %1114  ;;  %v961_v41 = vmax.f32 %v2344_v16, 0.0  ;;  %v1071_v16 = vld [vmem:[%s2757_s3 + $0x1f8] sm:$0xff] }
 0x136   :  { %v1400_v21 = vmul.f32 %v1115_v63, %v952_v13  ;;  %v1401_v34 = vmul.f32 %v1120_v32, %v953_v23  ;;  %v1405_v39 = vmul.f32 %v2557_v31, %v957_v24  ;;  %v958_v47 = vmax.f32 %v820_v25, 0.0  ;;  %v1068_v31 = vld [vmem:[%s2757_s3 + $0x1e0] sm:$0xff] }
 0x138   :  { %v1463_v11 = vadd.f32 %v1462_v59, %v1400_v21  ;;  %v2629_v29 = vpop.f32.mrf.mxu1  ;;  %v2632_v21 = vpop.f32.mrf.mxu2 }
 0x13a   :  { %v1464_v17 = vadd.f32 %v1463_v11, %v1401_v34  ;;  %1349 = vperm.xlu2 %1784, %v1063_v57   ;;  %v821_v13 = vpop.f32.mrf.mxu0 }
 0x13b   :  { %1344 = vperm.xlu1 %1783, %v1062_v38   ;;  %1339 = vperm.xlu0 %1782, %v1061_v56   ;;  %v822_v23 = vadd.f32 %v821_v13, %v2217_v9  ;;  %v1069_v9 = vld [vmem:[%s2757_s3 + $0x1e8] sm:$0xff]  ;;  %v960_v56 = vmax.f32 %v2320_v62, 0.0 }
 0x13c   :  { %v2617_v40 = vpop.permute.xlu2 %1184  ;;  %v1465_v49 = vadd.f32 %v1464_v17, %v1402_v8  ;;  %v1067_v17 = vld [vmem:[%s2757_s3 + $0x1d8] sm:$0xff] }
 0x13d   :  { %v1135_v45 = vpop.permute.xlu1 %1134  ;;  %v1130_v50 = vpop.permute.xlu0 %1129  ;;  %v959_v19 = vmax.f32 %v822_v23, 0.0 }
 0x13e   :  { %v1403_v61 = vmul.f32 %v1130_v50, %v955_v33  ;;  %v1404_v32 = vmul.f32 %v1135_v45, %v956_v46  ;;  %v1408_v33 = vmul.f32 %v2572_v22, %v960_v56  ;;  %v835_v22 = vadd.f32 %v2458_v36, %v2169_v55 }
 0x13f   :  { %v840_v36 = vadd.f32 %v2501_v54, %v2259_v27 }
 0x140   :  { %v1466_v63 = vadd.f32 %v1465_v49, %v1403_v61  ;;  %v854_v45 = vpop.f32.mrf.mxu1  ;;  %v962_v61 = vmax.f32 %v2362_v37, 0.0  ;;  %v2650_v49 = vpop.f32.mrf.mxu2  ;;  %v837_v37 = vadd.f32 %v2481_v20, %v2261_v28  ;;  %v964_v55 = vmax.f32 %v835_v22, 0.0 }
 0x142   :  { %v1467_v10 = vadd.f32 %v1466_v63, %v1404_v32  ;;  %1364 = vperm.xlu2 %1784, %v1066_v3   ;;  %v963_v3 = vmax.f32 %v2382_v6, 0.0  ;;  %v1070_v63 = vld [vmem:[%s2757_s3 + $0x1f0] sm:$0xff] }
 0x143   :  { %1359 = vperm.xlu1 %1783, %v1065_v2   ;;  %1354 = vperm.xlu0 %1782, %v1064_v60  }
 0x144   :  { %v2635_v34 = vpop.permute.xlu2 %1199  ;;  %v1468_v38 = vadd.f32 %v1467_v10, %v1405_v39  ;;  %v1411_v2 = vmul.f32 %v2594_v14, %v963_v3  ;;  %v965_v39 = vmax.f32 %v837_v37, 0.0 }
 0x145   :  { %v1150_v59 = vpop.permute.xlu1 %1149  ;;  %v1145_v57 = vpop.permute.xlu0 %1144 }
 0x146   :  { %v1406_v11 = vmul.f32 %v1145_v57, %v958_v47  ;;  %v1407_v58 = vmul.f32 %v1150_v59, %v959_v19  ;;  %v966_v57 = vmax.f32 %v840_v36, 0.0  ;;  %v842_v19 = vadd.f32 %v2532_v42, %v2198_v1 }
 0x147   :  { %v847_v1 = vadd.f32 %v2576_v35, %v2290_v43 }
 0x148   :  { %v1469_v51 = vadd.f32 %v1468_v38, %v1406_v11  ;;  %v856_v59 = vpop.f32.mrf.mxu1  ;;  %v2668_v28 = vpop.f32.mrf.mxu2  ;;  %v845_v38 = vadd.f32 %v2555_v48, %v2292_v44  ;;  %v1414_v27 = vmul.f32 %v2617_v40, %v966_v57  ;;  %v967_v56 = vmax.f32 %v842_v19, 0.0 }
 0x149   :  { %v2670_v11 = vpop.f32.mrf.mxu3  ;;  %v969_v44 = vmax.f32 %v847_v1, 0.0  ;;  %v852_v40 = vadd.f32 %v2629_v29, %v2307_v53  ;;  %v976_v19 = vmax.f32 %v2339_v12, 0.0  ;;  %v2792_v12 = vld [vmem:[#allocation10_spill] sm:$0xff] }
 0x14a   :  { %v1470_v8 = vadd.f32 %v1469_v51, %v1407_v58  ;;  %1379 = vperm.xlu2 %1784, %v1069_v9  }
 0x14b   :  { %1374 = vperm.xlu1 %1783, %v1068_v31   ;;  %1369 = vperm.xlu0 %1782, %v1067_v17   ;;  %v968_v17 = vmax.f32 %v845_v38, 0.0  ;;  %v971_v22 = vmax.f32 %v852_v40, 0.0  ;;  %v2793_v40 = vld [vmem:[#allocation19_spill] sm:$0xff] }
 0x14c   :  { %v1471_v62 = vadd.f32 %v1470_v8, %v1408_v33  ;;  %v1215_v24 = vpop.permute.xlu2 %1214  ;;  %v850_v33 = vadd.f32 %v2601_v26, %v2215_v7  ;;  %v855_v7 = vadd.f32 %v854_v45, %v2305_v52 }
 0x14d   :  { %v1165_v50 = vpop.permute.xlu1 %1164  ;;  %v1160_v46 = vpop.permute.xlu0 %1159 }
 0x14e   :  { %v1409_v13 = vmul.f32 %v1160_v46, %v961_v41  ;;  %v1410_v25 = vmul.f32 %v1165_v50, %v962_v61  ;;  %v970_v61 = vmax.f32 %v850_v33, 0.0  ;;  %v972_v37 = vmax.f32 %v855_v7, 0.0 }
 0x150   :  { %v1472_v32 = vadd.f32 %v1471_v62, %v1409_v13  ;;  %v859_v62 = vpop.f32.mrf.mxu1  ;;  %v2679_v48 = vpop.f32.mrf.mxu2  ;;  %v1417_v13 = vmul.f32 %v2635_v34, %v969_v44 }
 0x151   :  { %v2683_v46 = vpop.f32.mrf.mxu3  ;;  %v860_v53 = vadd.f32 %v859_v62, %v2326_v4 }
 0x152   :  { %v1473_v6 = vadd.f32 %v1472_v32, %v1410_v25  ;;  %v857_v32 = vadd.f32 %v856_v59, %v2242_v18 }
 0x153   :  { %1389 = vperm.xlu1 %1783, %v1071_v16   ;;  %1384 = vperm.xlu0 %1782, %v1070_v63   ;;  %v974_v52 = vmax.f32 %v860_v53, 0.0  ;;  %v2796_v53 = vld [vmem:[#allocation13_spill] sm:$0xff] }
 0x154   :  { %v1474_v60 = vadd.f32 %v1473_v6, %v1411_v2  ;;  %v1230_v54 = vpop.permute.xlu2 %1229  ;;  %v973_v34 = vmax.f32 %v857_v32, 0.0 }
 0x155   :  { %v1180_v23 = vpop.permute.xlu1 %1179  ;;  %v1175_v10 = vpop.permute.xlu0 %1174 }
 0x156   :  { %v1412_v47 = vmul.f32 %v1175_v10, %v964_v55  ;;  %v1413_v20 = vmul.f32 %v1180_v23, %v965_v39  ;;  %v1420_v55 = vmul.f32 %v1215_v24, %v972_v37  ;;  %v977_v24 = vmax.f32 %v2357_v30, 0.0 }
 0x158   :  { %v1475_v14 = vadd.f32 %v1474_v60, %v1412_v47  ;;  %v861_v2 = vpop.f32.mrf.mxu1  ;;  %v2689_v6 = vpop.f32.mrf.mxu2 }
 0x159   :  { %v2691_v23 = vpop.f32.mrf.mxu3  ;;  %v862_v45 = vadd.f32 %v861_v2, %v2324_v0 }
 0x15a   :  { %v1476_v9 = vadd.f32 %v1475_v14, %v1413_v20 }
 0x15b   :  { %v975_v57 = vmax.f32 %v862_v45, 0.0 }
 0x15c   :  { %v1477_v58 = vadd.f32 %v1476_v9, %v1414_v27  ;;  %v1245_v43 = vpop.permute.xlu2 %1244 }
 0x15d   :  { %v1195_v51 = vpop.permute.xlu1 %1194  ;;  %v1190_v31 = vpop.permute.xlu0 %1189  ;;  %v1423_v20 = vmul.f32 %v1230_v54, %v975_v57  ;;  %v877_v54 = vadd.f32 %v2581_v5, %v2792_v12 }
 0x15e   :  { %v1415_v42 = vmul.f32 %v1190_v31, %v967_v56  ;;  %v1416_v8 = vmul.f32 %v1195_v51, %v968_v17 }
 0x160   :  { %v1478_v41 = vadd.f32 %v1477_v58, %v1415_v42  ;;  %v894_v27 = vpop.f32.mrf.mxu2  ;;  %v2790_v58 = vld [vmem:[#allocation11_spill] sm:$0xff] }
 0x161   :  { %v978_v51 = vmax.f32 %v2790_v58, 0.0  ;;  %v2697_v0 = vpop.f32.mrf.mxu3 }
 0x162   :  { %v1479_v50 = vadd.f32 %v1478_v41, %v1416_v8  ;;  %v2791_v8 = vld [vmem:[#allocation15_spill] sm:$0xff] }
 0x163   :  { %v1426_v42 = vmul.f32 %v1245_v43, %v978_v51  ;;  %v979_v41 = vmax.f32 %v2791_v8, 0.0  ;;  %v2795_v43 = vld [vmem:[#allocation14_spill] sm:$0xff]  ;;  %v2800_v51 = vld [vmem:[#allocation8_spill] sm:$0xff] }
 0x164   :  { %v1480_v25 = vadd.f32 %v1479_v50, %v1417_v13  ;;  %v1260_v10 = vpop.permute.xlu2 %1259  ;;  %v980_v50 = vmax.f32 %v2793_v40, 0.0  ;;  %v981_v13 = vmax.f32 %v877_v54, 0.0  ;;  %v2802_v40 = vld [vmem:[#allocation21_spill] sm:$0xff] }
 0x165   :  { %v1210_v35 = vpop.permute.xlu1 %1209  ;;  %v1205_v3 = vpop.permute.xlu0 %1204 }
 0x166   :  { %v1418_v26 = vmul.f32 %v1205_v3, %v970_v61  ;;  %v1419_v16 = vmul.f32 %v1210_v35, %v971_v22  ;;  %v2794_v35 = vld [vmem:[#allocation6_spill] sm:$0xff] }
 0x167   :  { %v880_v3 = vadd.f32 %v2611_v15, %v2794_v35  ;;  %v2803_v35 = vld [vmem:[#allocation9_spill] sm:$0xff] }
 0x168   :  { %v1481_v63 = vadd.f32 %v1480_v25, %v1418_v26  ;;  %v896_v22 = vpop.f32.mrf.mxu2  ;;  %v882_v25 = vadd.f32 %v2632_v21, %v2795_v43 }
 0x169   :  { %v2707_v32 = vpop.f32.mrf.mxu3  ;;  %v982_v37 = vmax.f32 %v880_v3, 0.0 }
 0x16a   :  { %v1482_v29 = vadd.f32 %v1481_v63, %v1419_v16  ;;  %v1429_v16 = vmul.f32 %v1260_v10, %v981_v13 }
 0x16c   :  { %v1483_v39 = vadd.f32 %v1482_v29, %v1420_v55  ;;  %v1275_v31 = vpop.permute.xlu2 %1274  ;;  %v885_v29 = vadd.f32 %v2650_v49, %v2796_v53  ;;  %v2799_v49 = vld [vmem:[#allocation17_spill] sm:$0xff] }
 0x16d   :  { %v1225_v36 = vpop.permute.xlu1 %1224  ;;  %v1220_v60 = vpop.permute.xlu0 %1219 }
 0x16e   :  { %v1421_v18 = vmul.f32 %v1220_v60, %v973_v34  ;;  %v1422_v47 = vmul.f32 %v1225_v36, %v974_v52  ;;  %v983_v36 = vmax.f32 %v882_v25, 0.0  ;;  %v984_v60 = vmax.f32 %v885_v29, 0.0  ;;  %v2797_v52 = vld [vmem:[#allocation7_spill] sm:$0xff] }
 0x16f   :  { %v887_v45 = vadd.f32 %v2668_v28, %v2797_v52 }
 0x170   :  { %v1484_v59 = vadd.f32 %v1483_v39, %v1421_v18  ;;  %v2798_v39 = vld [vmem:[#allocation18_spill] sm:$0xff] }
 0x171   :  { %v890_v10 = vadd.f32 %v2679_v48, %v2798_v39 }
 0x172   :  { %v1485_v4 = vadd.f32 %v1484_v59, %v1422_v47  ;;  %v899_v47 = vpop.f32.mrf.mxu2  ;;  %v1432_v59 = vmul.f32 %v1275_v31, %v984_v60 }
 0x174   :  { %v1486_v56 = vadd.f32 %v1485_v4, %v1423_v20  ;;  %v1290_v5 = vpop.permute.xlu2 %1289  ;;  %v985_v4 = vmax.f32 %v887_v45, 0.0  ;;  %v892_v20 = vadd.f32 %v2689_v6, %v2799_v49  ;;  %v2808_v49 = vld [vmem:[#allocation16_spill] sm:$0xff] }
 0x175   :  { %v1240_v14 = vpop.permute.xlu1 %1239  ;;  %v1235_v38 = vpop.permute.xlu0 %1234 }
 0x176   :  { %v1424_v9 = vmul.f32 %v1235_v38, %v976_v19  ;;  %v1425_v17 = vmul.f32 %v1240_v14, %v977_v24  ;;  %v2715_v19 = vpop.f32.mrf.mxu3  ;;  %v987_v58 = vmax.f32 %v892_v20, 0.0  ;;  %v917_v20 = vadd.f32 %v2670_v11, %v2808_v49  ;;  %v2819_v49 = vld [vmem:[#allocation35_spill] sm:$0xff] }
 0x178   :  { %v1487_v1 = vadd.f32 %v1486_v56, %v1424_v9  ;;  %v986_v56 = vmax.f32 %v890_v10, 0.0 }
 0x17a   :  { %v1488_v33 = vadd.f32 %v1487_v1, %v1425_v17  ;;  %v895_v17 = vadd.f32 %v894_v27, %v2800_v51  ;;  %v901_v12 = vpop.f32.mrf.mxu2 }
 0x17b   :  { %v902_v27 = vadd.f32 %v901_v12, %v2803_v35 }
 0x17c   :  { %v1489_v62 = vadd.f32 %v1488_v33, %v1426_v42  ;;  %v1305_v14 = vpop.permute.xlu2 %1304  ;;  %v2801_v42 = vld [vmem:[#allocation22_spill] sm:$0xff]  ;;  %v1435_v33 = vmul.f32 %v1290_v5, %v987_v58 }
 0x17d   :  { %v1255_v44 = vpop.permute.xlu1 %1254  ;;  %v1250_v30 = vpop.permute.xlu0 %1249  ;;  %v897_v31 = vadd.f32 %v896_v22, %v2801_v42  ;;  %v991_v43 = vmax.f32 %v902_v27, 0.0  ;;  %v2811_v42 = vld [vmem:[#allocation29_spill] sm:$0xff]  ;;  %v2814_v27 = vld [vmem:[#allocation31_spill] sm:$0xff] }
 0x17e   :  { %v1427_v61 = vmul.f32 %v1250_v30, %v979_v41  ;;  %v1428_v7 = vmul.f32 %v1255_v44, %v980_v50  ;;  %v988_v41 = vmax.f32 %v895_v17, 0.0  ;;  %v2721_v44 = vpop.f32.mrf.mxu3  ;;  %v900_v50 = vadd.f32 %v899_v47, %v2802_v40 }
 0x17f   :  { %v989_v30 = vmax.f32 %v897_v31, 0.0  ;;  %v922_v31 = vadd.f32 %v2691_v23, %v2811_v42  ;;  %v930_v23 = vadd.f32 %v2715_v19, %v2814_v27 }
 0x180   :  { %v1490_v26 = vadd.f32 %v1489_v62, %v1427_v61 }
 0x182   :  { %v1491_v63 = vadd.f32 %v1490_v26, %v1428_v7  ;;  %v990_v26 = vmax.f32 %v900_v50, 0.0 }
 0x184   :  { %v1492_v2 = vadd.f32 %v1491_v63, %v1429_v16  ;;  %v1320_v61 = vpop.permute.xlu2 %1319  ;;  %v1438_v25 = vmul.f32 %v1305_v14, %v990_v26  ;;  %v2804_v63 = vld [vmem:[#allocation25_spill] sm:$0xff]  ;;  %v2809_v14 = vld [vmem:[#allocation27_spill] sm:$0xff] }
 0x185   :  { %v1270_v34 = vpop.permute.xlu1 %1269  ;;  %v1265_v55 = vpop.permute.xlu0 %1264 }
 0x186   :  { %v1430_v15 = vmul.f32 %v1265_v55, %v982_v37  ;;  %v1431_v18 = vmul.f32 %v1270_v34, %v983_v36  ;;  %v992_v37 = vmax.f32 %v2804_v63, 0.0  ;;  %v934_v55 = vpop.f32.mrf.mxu3 }
 0x188   :  { %v1493_v21 = vadd.f32 %v1492_v2, %v1430_v15  ;;  %v2805_v2 = vld [vmem:[#allocation24_spill] sm:$0xff] }
 0x189   :  { %v993_v34 = vmax.f32 %v2805_v2, 0.0 }
 0x18a   :  { %v1494_v57 = vadd.f32 %v1493_v21, %v1431_v18  ;;  %v2806_v18 = vld [vmem:[#allocation12_spill] sm:$0xff] }
 0x18b   :  { %v1441_v52 = vmul.f32 %v1320_v61, %v993_v34  ;;  %v994_v21 = vmax.f32 %v2806_v18, 0.0 }
 0x18c   :  { %v1495_v38 = vadd.f32 %v1494_v57, %v1432_v59  ;;  %v1335_v36 = vpop.permute.xlu2 %1334  ;;  %v2807_v59 = vld [vmem:[#allocation28_spill] sm:$0xff] }
 0x18d   :  { %v1285_v24 = vpop.permute.xlu1 %1284  ;;  %v1280_v9 = vpop.permute.xlu0 %1279  ;;  %v995_v57 = vmax.f32 %v2807_v59, 0.0  ;;  %v2818_v59 = vld [vmem:[#allocation26_spill] sm:$0xff] }
 0x18e   :  { %v1433_v28 = vmul.f32 %v1280_v9, %v985_v4  ;;  %v1434_v1 = vmul.f32 %v1285_v24, %v986_v56  ;;  %v2810_v56 = vld [vmem:[#allocation30_spill] sm:$0xff]  ;;  %v936_v58 = vpop.f32.mrf.mxu3 }
 0x190   :  { %v1496_v48 = vadd.f32 %v1495_v38, %v1433_v28  ;;  %v996_v38 = vmax.f32 %v2809_v14, 0.0  ;;  %v920_v28 = vadd.f32 %v2683_v46, %v2810_v56  ;;  %v2813_v46 = vld [vmem:[#allocation32_spill] sm:$0xff] }
 0x191   :  { %v927_v50 = vadd.f32 %v2707_v32, %v2813_v46  ;;  %v2816_v32 = vld [vmem:[#allocation34_spill] sm:$0xff] }
 0x192   :  { %v1497_v8 = vadd.f32 %v1496_v48, %v1434_v1  ;;  %v1444_v51 = vmul.f32 %v1335_v36, %v996_v38  ;;  %v997_v48 = vmax.f32 %v917_v20, 0.0  ;;  %v998_v12 = vmax.f32 %v920_v28, 0.0 }
 0x194   :  { %v1498_v54 = vadd.f32 %v1497_v8, %v1435_v33  ;;  %v1350_v17 = vpop.permute.xlu2 %1349 }
 0x195   :  { %v1300_v62 = vpop.permute.xlu1 %1299  ;;  %v1295_v6 = vpop.permute.xlu0 %1294 }
 0x196   :  { %v1436_v13 = vmul.f32 %v1295_v6, %v988_v41  ;;  %v1437_v3 = vmul.f32 %v1300_v62, %v989_v30  ;;  %v2812_v62 = vld [vmem:[#allocation20_spill] sm:$0xff] }
 0x197   :  { %v925_v6 = vadd.f32 %v2697_v0, %v2812_v62  ;;  %v2815_v0 = vld [vmem:[#allocation23_spill] sm:$0xff] }
 0x198   :  { %v1499_v7 = vadd.f32 %v1498_v54, %v1436_v13  ;;  %v999_v54 = vmax.f32 %v922_v31, 0.0  ;;  %v932_v63 = vadd.f32 %v2721_v44, %v2815_v0 }
 0x199   :  { %v1000_v35 = vmax.f32 %v925_v6, 0.0 }
 0x19a   :  { %v1500_v22 = vadd.f32 %v1499_v7, %v1437_v3  ;;  %v1447_v61 = vmul.f32 %v1350_v17, %v999_v54  ;;  %v939_v3 = vpop.f32.mrf.mxu3  ;;  %v1003_v36 = vmax.f32 %v932_v63, 0.0 }
 0x19c   :  { %v1501_v29 = vadd.f32 %v1500_v22, %v1438_v25  ;;  %v1365_v7 = vpop.permute.xlu2 %1364  ;;  %v1001_v25 = vmax.f32 %v927_v50, 0.0 }
 0x19d   :  { %v1315_v16 = vpop.permute.xlu1 %1314  ;;  %v1310_v5 = vpop.permute.xlu0 %1309 }
 0x19e   :  { %v1439_v53 = vmul.f32 %v1310_v5, %v991_v43  ;;  %v1440_v15 = vmul.f32 %v1315_v16, %v992_v37  ;;  %v1002_v5 = vmax.f32 %v930_v23, 0.0 }
 0x1a0   :  { %v1502_v60 = vadd.f32 %v1501_v29, %v1439_v53  ;;  %v935_v29 = vadd.f32 %v934_v55, %v2816_v32  ;;  %v1450_v2 = vmul.f32 %v1365_v7, %v1002_v5 }
 0x1a2   :  { %v1503_v45 = vadd.f32 %v1502_v60, %v1440_v15  ;;  %v2817_v15 = vld [vmem:[#allocation33_spill] sm:$0xff]  ;;  %v1004_v18 = vmax.f32 %v935_v29, 0.0 }
 0x1a3   :  { %v937_v19 = vadd.f32 %v936_v58, %v2817_v15 }
 0x1a4   :  { %v1504_v39 = vadd.f32 %v1503_v45, %v1441_v52 }
 0x1a5   :  { %v1330_v10 = vpop.permute.xlu1 %1329  ;;  %v1325_v47 = vpop.permute.xlu0 %1324 }
 0x1a6   :  { %v1442_v4 = vmul.f32 %v1325_v47, %v994_v21  ;;  %v1443_v24 = vmul.f32 %v1330_v10, %v995_v57  ;;  %v1380_v10 = vpop.permute.xlu2 %1379  ;;  %v1005_v47 = vmax.f32 %v937_v19, 0.0  ;;  %v940_v57 = vadd.f32 %v939_v3, %v2818_v59 }
 0x1a8   :  { %v1505_v9 = vadd.f32 %v1504_v39, %v1442_v4  ;;  %v941_v39 = vpop.f32.mrf.mxu3  ;;  %v1453_v55 = vmul.f32 %v1380_v10, %v1005_v47  ;;  %v1006_v38 = vmax.f32 %v940_v57, 0.0 }
 0x1a9   :  { %v942_v20 = vadd.f32 %v941_v39, %v2819_v49 }
 0x1aa   :  { %v1506_v1 = vadd.f32 %v1505_v9, %v1443_v24 }
 0x1ab   :  { %v1007_v28 = vmax.f32 %v942_v20, 0.0 }
 0x1ac   :  { %v1507_v33 = vadd.f32 %v1506_v1, %v1444_v51 }
 0x1ad   :  { %v1345_v8 = vpop.permute.xlu1 %1344  ;;  %v1340_v41 = vpop.permute.xlu0 %1339 }
 0x1ae   :  { %v1445_v11 = vmul.f32 %v1340_v41, %v997_v48  ;;  %v1446_v30 = vmul.f32 %v1345_v8, %v998_v12  ;;  %v1526_v41 = vstv %s2758_s4  ;;  %s1555_s4 = sshll.u32 %s2759_s5, 4  ;;  %s1556_s4 = int_to_ptr.hbm [resolvable:$true] %s1555_s4 }
 0x1b0   :  { %v1508_v40 = vadd.f32 %v1507_v33, %v1445_v11 }
 0x1b2   :  { %v1509_v13 = vadd.f32 %v1508_v40, %v1446_v30 }
 0x1b4   :  { %v1510_v26 = vadd.f32 %v1509_v13, %v1447_v61 }
 0x1b5   :  { %v1360_v22 = vpop.permute.xlu1 %1359  ;;  %v1355_v43 = vpop.permute.xlu0 %1354 }
 0x1b6   :  { %v1448_v16 = vmul.f32 %v1355_v43, %v1000_v35  ;;  %v1449_v37 = vmul.f32 %v1360_v22, %v1001_v25 }
 0x1b8   :  { %v1511_v53 = vadd.f32 %v1510_v26, %v1448_v16 }
 0x1ba   :  { %v1512_v34 = vadd.f32 %v1511_v53, %v1449_v37 }
 0x1bc   :  { %v1513_v60 = vadd.f32 %v1512_v34, %v1450_v2 }
 0x1bd   :  { %v1375_v52 = vpop.permute.xlu1 %1374  ;;  %v1370_v45 = vpop.permute.xlu0 %1369 }
 0x1be   :  { %v1451_v21 = vmul.f32 %v1370_v45, %v1003_v36  ;;  %v1452_v44 = vmul.f32 %v1375_v52, %v1004_v18 }
 0x1c0   :  { %v1514_v4 = vadd.f32 %v1513_v60, %v1451_v21 }
 0x1c2   :  { %v1515_v14 = vadd.f32 %v1514_v4, %v1452_v44 }
 0x1c4   :  { %v1516_v24 = vadd.f32 %v1515_v14, %v1453_v55 }
 0x1c5   :  { %v1390_v9 = vpop.permute.xlu1 %1389  ;;  %v1385_v56 = vpop.permute.xlu0 %1384 }
 0x1c6   :  { %v1454_v58 = vmul.f32 %v1385_v56, %v1006_v38  ;;  %v1455_v51 = vmul.f32 %v1390_v9, %v1007_v28 }
 0x1c8   :  { %v1517_v17 = vadd.f32 %v1516_v24, %v1454_v58 }
 0x1ca   :  { %v1518_v1 = vadd.f32 %v1517_v17, %v1455_v51 }
 0x1cc   :  { %v1519_v48 = vrot.slane %v1518_v1, 4 }
 0x1ce   :  { %v1520_v42 = vadd.f32 %v1519_v48, %v1518_v1 }
 0x1d0   :  { %v1521_v31 = vrot.slane %v1520_v42, 2 }
 0x1d2   :  { %v1522_v33 = vadd.f32 %v1521_v31, %v1520_v42 }
 0x1d4   :  { %v1523_v8 = vrot.slane %v1522_v33, 1 }
 0x1d6   :  { %v1524_v12 = vadd.f32 %v1523_v8, %v1522_v33 }
 0x1d8   :  { %v1527_v11 = vadd.f32 %v1526_v41, %v1524_v12 }
 0x1da   :  { %v1528_v54 = vsub.f32 0.0, %v1527_v11 }
 0x1dc   :  { %v1529_v62 = vmul.f32 1.442695, %v1528_v54 }
 0x1de   :  { %1785 = vpow2.f32 %v1529_v62 }
 0x1e4   :  { %v1786_v6 = vpop.eup %1785 }
 0x1e5   :  { %v1531_v30 = vadd.f32 1.0, %v1786_v6 }
 0x1e7   :  { %1787 = vrcp.f32 %v1531_v30  ;;  %v1543_v61 = vand.u32 2147483648, %v1531_v30  ;;  %v1541_v35 = vand.u32 2147483647, %v1531_v30  ;;  %vm1537_vm2 = vweird.f32 %v1531_v30 }
 0x1e9   :  { %v1544_v23 = vor.u32 1.1754944e-38, %v1543_v61  ;;  %vm1542_vm4 = vcmp.eq.f32.partialorder %v1541_v35, 8.507059e+37 }
 0x1ed   :  { %v1788_v40 = vpop.eup %1787 }
 0x1ee   :  { %v1533_v46 = vmul.f32 %v1788_v40, %v1531_v30  ;;  %vm1538_vm1 = vweird.f32 %v1788_v40 }
 0x1ef   :  { %vm1539_vm3 = vmor %vm1537_vm2, %vm1538_vm1 }
 0x1f0   :  { %v1534_v50 = vsub.f32 1.0, %v1533_v46 }
 0x1f2   :  { %v1535_v13 = vmul.f32 %v1788_v40, %v1534_v50 }
 0x1f4   :  { %v1536_v27 = vadd.f32 %v1788_v40, %v1535_v13 }
 0x1f6   :  { %v1540_v3 = vsel %vm1539_vm3, %v1788_v40, %v1536_v27 }
 0x1f7   :  { %v1545_v7 = vsel %vm1542_vm4, %v1544_v23, %v1540_v3 }
 0x1f8   :  { %1547 = vst [vmem:[#allocation3] sm:$0x1] %v1545_v7 }
 0x1f9   :  { %1558 = dma.vmem_to_hbm [thread:$0]  %s1554_s26, 16, %s1556_s4, [#allocation4]  }
 0x1fa   :  { %1813 = dma.done.wait [#allocation4], 16  }
 0x1fb   :  { %1814 = vsyncadd [#allocation4], 4294967280 }
 0x1fc   :  { %1563 = vsyncpa [#allocation4], 1 }

// kernel: tpu_custom_call.1
= control target key start
LH: loop header
LB: loop body
LE: loop exit
PB: predicated region body
PF: predicated region fallthrough
CT: control target
= control target key end

     0   :  { %v1815_v3 = vmov 0   ;;  %vm654_vm0 = vcmask 261120   ;;  %s2754_s0 = inlined_call_operand.vmem [shape: f32[128,32], index: 0, kind: input, shape index: {}]   ;;  %s2755_s1 = inlined_call_operand.vmem [shape: bf16[512,32], index: 1, kind: input, shape index: {}]   ;;  %s2756_s2 = inlined_call_operand.vmem [shape: f32[512,1], index: 2, kind: input, shape index: {}]   ;;  %s2757_s3 = inlined_call_operand.vmem [shape: f32[512,1], index: 3, kind: input, shape index: {}]   ;;  %s2758_s4 = inlined_call_operand.<no memory space> [shape: f32[1], index: 4, kind: input, shape index: {}]   ;;  %s2759_s5 = inlined_call_operand.hbm [shape: f32[1,1,128], index: 5, kind: output, shape index: {}]  }
   0x1   :  { %v114_v0 = vld [vmem:[%s2756_s2 + $0x20] sm:$0xff]  ;;  %v112_v1 = vld [vmem:[%s2756_s2 + $0x10] sm:$0xff]  ;;  %1784 = vset.pattern.permute.xlu2 %v1815_v3  ;;  %1783 = vset.pattern.permute.xlu1 %v1815_v3  ;;  %v37_v5 = vld [vmem:[%s2754_s0 + $0x78] sm:$0xff] }
   0x2   :  { %v110_v2 = vld [vmem:[%s2756_s2] sm:$0xff]  ;;  %v36_v4 = vld [vmem:[%s2754_s0 + $0x70] sm:$0xff]  ;;  %1782 = vset.pattern.permute.xlu0 %v1815_v3  ;;  %196 = vperm.xlu2 %1784, %v114_v0   ;;  %v35_v8 = vld [vmem:[%s2754_s0 + $0x68] sm:$0xff] }
   0x3   :  { %v45_v6 = vpack.c.bf16 %v37_v5, %v36_v4  ;;  %186 = vperm.xlu1 %1783, %v112_v1   ;;  %176 = vperm.xlu0 %1782, %v110_v2   ;;  %v34_v7 = vld [vmem:[%s2754_s0 + $0x60] sm:$0xff]  ;;  %v115_v11 = vld [vmem:[%s2756_s2 + $0x28] sm:$0xff]  ;;  %v113_v12 = vld [vmem:[%s2756_s2 + $0x18] sm:$0xff] }
   0x4   :  { %v44_v10 = vpack.c.bf16 %v35_v8, %v34_v7  ;;  %v111_v13 = vld [vmem:[%s2756_s2 + $0x8] sm:$0xff] }
   0x5   :  { %v773_v9 = vsel %vm654_vm0, %v45_v6, 0 }
   0x6   :  { %775 = vmatpush.bf16.xpose.msra.mxu0 %v773_v9  ;;  %1756 = vmatpush.bf16.xpose.msra.mxu1 %v773_v9 }
   0x7   :  { %1757 = vmatpush.bf16.xpose.msra.mxu2 %v773_v9  ;;  %1758 = vmatpush.bf16.xpose.msra.mxu3 %v773_v9 }
   0x8   :  { %11 = vsyncpa [#allocation4], 0  ;;  %v770_v14 = vsel %vm654_vm0, %v44_v10, 0  ;;  %v32_v15 = vld [vmem:[%s2754_s0 + $0x50] sm:$0xff]  ;;  %v33_v16 = vld [vmem:[%s2754_s0 + $0x58] sm:$0xff]  ;;  %s1816_s25 = smov [#allocation3]  }
   0x9   :  { %v43_v17 = vpack.c.bf16 %v33_v16, %v32_v15  ;;  %v118_v18 = vld [vmem:[%s2756_s2 + $0x40] sm:$0xff]  ;;  %v117_v19 = vld [vmem:[%s2756_s2 + $0x38] sm:$0xff]  ;;  %v116_v20 = vld [vmem:[%s2756_s2 + $0x30] sm:$0xff]  ;;  %s1553_s26 = sshll.u32 %s1816_s25, 4  ;;  %s1554_s26 = int_to_ptr.vmem [resolvable:$true] %s1553_s26 }
   0xa   :  { %201 = vperm.xlu2 %1784, %v115_v11   ;;  %v30_v22 = vld [vmem:[%s2754_s0 + $0x40] sm:$0xff]  ;;  %v31_v23 = vld [vmem:[%s2754_s0 + $0x48] sm:$0xff]  ;;  %v121_v25 = vld [vmem:[%s2756_s2 + $0x58] sm:$0xff] }
   0xb   :  { %191 = vperm.xlu1 %1783, %v113_v12   ;;  %181 = vperm.xlu0 %1782, %v111_v13   ;;  %v767_v21 = vsel %vm654_vm0, %v43_v17, 0  ;;  %v42_v24 = vpack.c.bf16 %v31_v23, %v30_v22  ;;  %v120_v26 = vld [vmem:[%s2756_s2 + $0x50] sm:$0xff]  ;;  %v119_v27 = vld [vmem:[%s2756_s2 + $0x48] sm:$0xff]  ;;  %v29_v30 = vld [vmem:[%s2754_s0 + $0x38] sm:$0xff] }
   0xc   :  { %v28_v29 = vld [vmem:[%s2754_s0 + $0x30] sm:$0xff]  ;;  %v123_v33 = vld [vmem:[%s2756_s2 + $0x68] sm:$0xff]  ;;  %v122_v34 = vld [vmem:[%s2756_s2 + $0x60] sm:$0xff] }
   0xd   :  { %v764_v28 = vsel %vm654_vm0, %v42_v24, 0  ;;  %v41_v31 = vpack.c.bf16 %v29_v30, %v28_v29  ;;  %v124_v32 = vld [vmem:[%s2756_s2 + $0x70] sm:$0xff]  ;;  %v26_v36 = vld [vmem:[%s2754_s0 + $0x20] sm:$0xff]  ;;  %v27_v37 = vld [vmem:[%s2754_s0 + $0x28] sm:$0xff] }
   0xe   :  { %776 = vmatpush.bf16.xpose.msra.mxu0 %v770_v14  ;;  %1759 = vmatpush.bf16.xpose.msra.mxu1 %v770_v14  ;;  %v40_v38 = vpack.c.bf16 %v27_v37, %v26_v36  ;;  %v127_v39 = vld [vmem:[%s2756_s2 + $0x88] sm:$0xff]  ;;  %v126_v40 = vld [vmem:[%s2756_s2 + $0x80] sm:$0xff]  ;;  %v125_v41 = vld [vmem:[%s2756_s2 + $0x78] sm:$0xff] }
   0xf   :  { %1760 = vmatpush.bf16.xpose.msra.mxu2 %v770_v14  ;;  %1761 = vmatpush.bf16.xpose.msra.mxu3 %v770_v14  ;;  %v761_v35 = vsel %vm654_vm0, %v41_v31, 0  ;;  %v24_v43 = vld [vmem:[%s2754_s0 + $0x10] sm:$0xff]  ;;  %v25_v44 = vld [vmem:[%s2754_s0 + $0x18] sm:$0xff]  ;;  %v130_v46 = vld [vmem:[%s2756_s2 + $0xa0] sm:$0xff] }
  0x10   :  { %v758_v42 = vsel %vm654_vm0, %v40_v38, 0  ;;  %v39_v45 = vpack.c.bf16 %v25_v44, %v24_v43  ;;  %v129_v47 = vld [vmem:[%s2756_s2 + $0x98] sm:$0xff]  ;;  %v128_v48 = vld [vmem:[%s2756_s2 + $0x90] sm:$0xff]  ;;  %v22_v50 = vld [vmem:[%s2754_s0] sm:$0xff] }
  0x11   :  { %v23_v51 = vld [vmem:[%s2754_s0 + $0x8] sm:$0xff]  ;;  %v133_v53 = vld [vmem:[%s2756_s2 + $0xb8] sm:$0xff]  ;;  %v132_v54 = vld [vmem:[%s2756_s2 + $0xb0] sm:$0xff] }
  0x12   :  { %216 = vperm.xlu2 %1784, %v118_v18   ;;  %v755_v49 = vsel %vm654_vm0, %v39_v45, 0  ;;  %v38_v52 = vpack.c.bf16 %v23_v51, %v22_v50  ;;  %v131_v55 = vld [vmem:[%s2756_s2 + $0xa8] sm:$0xff]  ;;  %v136_v57 = vld [vmem:[%s2756_s2 + $0xd0] sm:$0xff]  ;;  %v134_v59 = vld [vmem:[%s2756_s2 + $0xc0] sm:$0xff] }
  0x13   :  { %211 = vperm.xlu1 %1783, %v117_v19   ;;  %206 = vperm.xlu0 %1782, %v116_v20   ;;  %v135_v58 = vld [vmem:[%s2756_s2 + $0xc8] sm:$0xff]  ;;  %v1724_v60 = vld [vmem:[%s2755_s1] sm:$0xff]  ;;  %v137_v2 = vld [vmem:[%s2756_s2 + $0xd8] sm:$0xff] }
  0x14   :  { %v752_v56 = vsel %vm654_vm0, %v38_v52, 0  ;;  %v1732_v61 = vld [vmem:[%s2755_s1 + $0x40] sm:$0xff]  ;;  %v139_v0 = vld [vmem:[%s2756_s2 + $0xe8] sm:$0xff]  ;;  %v141_v4 = vld [vmem:[%s2756_s2 + $0xf8] sm:$0xff] }
  0x15   :  { %v1740_v62 = vld [vmem:[%s2755_s1 + $0x80] sm:$0xff]  ;;  %v140_v5 = vld [vmem:[%s2756_s2 + $0xf0] sm:$0xff]  ;;  %v1725_v6 = vld [vmem:[%s2755_s1 + $0x8] sm:$0xff] }
  0x16   :  { %777 = vmatpush.bf16.xpose.msra.mxu0 %v767_v21  ;;  %1762 = vmatpush.bf16.xpose.msra.mxu1 %v767_v21  ;;  %v1748_v63 = vld [vmem:[%s2755_s1 + $0xc0] sm:$0xff]  ;;  %v1733_v7 = vld [vmem:[%s2755_s1 + $0x48] sm:$0xff]  ;;  %v145_v10 = vld [vmem:[%s2756_s2 + $0x118] sm:$0xff] }
  0x17   :  { %1763 = vmatpush.bf16.xpose.msra.mxu2 %v767_v21  ;;  %1764 = vmatpush.bf16.xpose.msra.mxu3 %v767_v21  ;;  %v138_v1 = vld [vmem:[%s2756_s2 + $0xe0] sm:$0xff]  ;;  %v1741_v8 = vld [vmem:[%s2755_s1 + $0x88] sm:$0xff]  ;;  %v144_v11 = vld [vmem:[%s2756_s2 + $0x110] sm:$0xff] }
  0x18   :  { %v142_v3 = vld [vmem:[%s2756_s2 + $0x100] sm:$0xff]  ;;  %v1749_v9 = vld [vmem:[%s2755_s1 + $0xc8] sm:$0xff]  ;;  %v148_v14 = vld [vmem:[%s2756_s2 + $0x130] sm:$0xff] }
  0x19   :  { %v143_v12 = vld [vmem:[%s2756_s2 + $0x108] sm:$0xff]  ;;  %v146_v16 = vld [vmem:[%s2756_s2 + $0x120] sm:$0xff]  ;;  %v1726_v17 = vld [vmem:[%s2755_s1 + $0x10] sm:$0xff] }
  0x1a   :  { %231 = vperm.xlu2 %1784, %v121_v25   ;;  %v147_v15 = vld [vmem:[%s2756_s2 + $0x128] sm:$0xff]  ;;  %v1734_v18 = vld [vmem:[%s2755_s1 + $0x50] sm:$0xff]  ;;  %v150_v23 = vld [vmem:[%s2756_s2 + $0x140] sm:$0xff] }
  0x1b   :  { %226 = vperm.xlu1 %1783, %v120_v26   ;;  %221 = vperm.xlu0 %1782, %v119_v27   ;;  %v1742_v19 = vld [vmem:[%s2755_s1 + $0x90] sm:$0xff]  ;;  %v151_v22 = vld [vmem:[%s2756_s2 + $0x148] sm:$0xff]  ;;  %v149_v24 = vld [vmem:[%s2756_s2 + $0x138] sm:$0xff] }
  0x1c   :  { %v1750_v20 = vld [vmem:[%s2755_s1 + $0xd0] sm:$0xff]  ;;  %v154_v26 = vld [vmem:[%s2756_s2 + $0x160] sm:$0xff]  ;;  %v153_v27 = vld [vmem:[%s2756_s2 + $0x158] sm:$0xff] }
  0x1d   :  { %v1727_v29 = vld [vmem:[%s2755_s1 + $0x18] sm:$0xff]  ;;  %v156_v37 = vld [vmem:[%s2756_s2 + $0x170] sm:$0xff]  ;;  %v155_v38 = vld [vmem:[%s2756_s2 + $0x168] sm:$0xff] }
  0x1e   :  { %778 = vmatpush.bf16.xpose.msra.mxu0 %v764_v28  ;;  %1765 = vmatpush.bf16.xpose.msra.mxu1 %v764_v28  ;;  %v1735_v30 = vld [vmem:[%s2755_s1 + $0x58] sm:$0xff]  ;;  %v159_v43 = vld [vmem:[%s2756_s2 + $0x188] sm:$0xff]  ;;  %v158_v44 = vld [vmem:[%s2756_s2 + $0x180] sm:$0xff] }
  0x1f   :  { %1766 = vmatpush.bf16.xpose.msra.mxu2 %v764_v28  ;;  %1767 = vmatpush.bf16.xpose.msra.mxu3 %v764_v28  ;;  %v152_v28 = vld [vmem:[%s2756_s2 + $0x150] sm:$0xff]  ;;  %v1743_v31 = vld [vmem:[%s2755_s1 + $0x98] sm:$0xff]  ;;  %v1728_v45 = vld [vmem:[%s2755_s1 + $0x20] sm:$0xff] }
  0x20   :  { %v157_v36 = vld [vmem:[%s2756_s2 + $0x178] sm:$0xff]  ;;  %v163_v52 = vld [vmem:[%s2756_s2 + $0x1a8] sm:$0xff] }
  0x22   :  { %246 = vperm.xlu2 %1784, %v124_v32   ;;  %v1751_v32 = vld [vmem:[%s2755_s1 + $0xd8] sm:$0xff] }
  0x23   :  { %241 = vperm.xlu1 %1783, %v123_v33   ;;  %236 = vperm.xlu0 %1782, %v122_v34  }
  0x26   :  { %779 = vmatpush.bf16.xpose.msra.mxu0 %v761_v35  ;;  %1768 = vmatpush.bf16.xpose.msra.mxu1 %v761_v35 }
  0x27   :  { %1769 = vmatpush.bf16.xpose.msra.mxu2 %v761_v35  ;;  %1770 = vmatpush.bf16.xpose.msra.mxu3 %v761_v35 }
  0x2a   :  { %261 = vperm.xlu2 %1784, %v127_v39  }
  0x2b   :  { %256 = vperm.xlu1 %1783, %v126_v40   ;;  %251 = vperm.xlu0 %1782, %v125_v41  }
  0x2e   :  { %780 = vmatpush.bf16.xpose.msra.mxu0 %v758_v42  ;;  %1771 = vmatpush.bf16.xpose.msra.mxu1 %v758_v42 }
  0x2f   :  { %1772 = vmatpush.bf16.xpose.msra.mxu2 %v758_v42  ;;  %1773 = vmatpush.bf16.xpose.msra.mxu3 %v758_v42  ;;  %v160_v42 = vld [vmem:[%s2756_s2 + $0x190] sm:$0xff] }
  0x32   :  { %276 = vperm.xlu2 %1784, %v130_v46   ;;  %v1736_v46 = vld [vmem:[%s2755_s1 + $0x60] sm:$0xff] }
  0x33   :  { %271 = vperm.xlu1 %1783, %v129_v47   ;;  %266 = vperm.xlu0 %1782, %v128_v48   ;;  %v1744_v47 = vld [vmem:[%s2755_s1 + $0xa0] sm:$0xff] }
  0x34   :  { %v1752_v48 = vld [vmem:[%s2755_s1 + $0xe0] sm:$0xff] }
  0x36   :  { %781 = vmatpush.bf16.xpose.msra.mxu0 %v755_v49  ;;  %1774 = vmatpush.bf16.xpose.msra.mxu1 %v755_v49 }
  0x37   :  { %1775 = vmatpush.bf16.xpose.msra.mxu2 %v755_v49  ;;  %1776 = vmatpush.bf16.xpose.msra.mxu3 %v755_v49 }
  0x3a   :  { %291 = vperm.xlu2 %1784, %v133_v53   ;;  %v162_v53 = vld [vmem:[%s2756_s2 + $0x1a0] sm:$0xff] }
  0x3b   :  { %286 = vperm.xlu1 %1783, %v132_v54   ;;  %281 = vperm.xlu0 %1782, %v131_v55   ;;  %v161_v54 = vld [vmem:[%s2756_s2 + $0x198] sm:$0xff] }
  0x3e   :  { %782 = vmatpush.bf16.xpose.msra.mxu0 %v752_v56  ;;  %1777 = vmatpush.bf16.xpose.msra.mxu1 %v752_v56 }
  0x3f   :  { %1778 = vmatpush.bf16.xpose.msra.mxu2 %v752_v56  ;;  %1779 = vmatpush.bf16.xpose.msra.mxu3 %v752_v56 }
  0x42   :  { %306 = vperm.xlu2 %1784, %v136_v57  }
  0x43   :  { %301 = vperm.xlu1 %1783, %v135_v58   ;;  %296 = vperm.xlu0 %1782, %v134_v59   ;;  %v166_v58 = vld [vmem:[%s2756_s2 + $0x1c0] sm:$0xff]  ;;  %v165_v59 = vld [vmem:[%s2756_s2 + $0x1b8] sm:$0xff] }
  0x45   :  { %1692 = vmatmul.msk.bf16.vlgmr.msra.gmra.mxu0 %vm654_vm0, %v1724_v60  ;;  %1700 = vmatmul.msk.bf16.vlgmr.msra.gmra.mxu1 %vm654_vm0, %v1732_v61  ;;  %v164_v60 = vld [vmem:[%s2756_s2 + $0x1b0] sm:$0xff]  ;;  %v1729_v61 = vld [vmem:[%s2755_s1 + $0x28] sm:$0xff] }
  0x46   :  { %1708 = vmatmul.msk.bf16.vlgmr.msra.gmra.mxu2 %vm654_vm0, %v1740_v62  ;;  %1716 = vmatmul.msk.bf16.vlgmr.msra.gmra.mxu3 %vm654_vm0, %v1748_v63  ;;  %v1737_v62 = vld [vmem:[%s2755_s1 + $0x68] sm:$0xff] }
  0x47   :  { %v1745_v63 = vld [vmem:[%s2755_s1 + $0xa8] sm:$0xff] }
  0x4a   :  { %321 = vperm.xlu2 %1784, %v139_v0   ;;  %v1753_v0 = vld [vmem:[%s2755_s1 + $0xe8] sm:$0xff] }
  0x4b   :  { %316 = vperm.xlu1 %1783, %v138_v1   ;;  %311 = vperm.xlu0 %1782, %v137_v2  }
  0x52   :  { %336 = vperm.xlu2 %1784, %v142_v3  }
  0x53   :  { %331 = vperm.xlu1 %1783, %v141_v4   ;;  %326 = vperm.xlu0 %1782, %v140_v5   ;;  %v169_v4 = vld [vmem:[%s2756_s2 + $0x1d8] sm:$0xff]  ;;  %v168_v5 = vld [vmem:[%s2756_s2 + $0x1d0] sm:$0xff] }
  0x55   :  { %1693 = vmatmul.msk.bf16.gmra.mxu0 %vm654_vm0, %v1725_v6  ;;  %1701 = vmatmul.msk.bf16.gmra.mxu1 %vm654_vm0, %v1733_v7  ;;  %v167_v6 = vld [vmem:[%s2756_s2 + $0x1c8] sm:$0xff] }
  0x56   :  { %1709 = vmatmul.msk.bf16.gmra.mxu2 %vm654_vm0, %v1741_v8  ;;  %1717 = vmatmul.msk.bf16.gmra.mxu3 %vm654_vm0, %v1749_v9 }
  0x5a   :  { %351 = vperm.xlu2 %1784, %v145_v10   ;;  %v172_v10 = vld [vmem:[%s2756_s2 + $0x1f0] sm:$0xff] }
  0x5b   :  { %346 = vperm.xlu1 %1783, %v144_v11   ;;  %341 = vperm.xlu0 %1782, %v143_v12   ;;  %v171_v11 = vld [vmem:[%s2756_s2 + $0x1e8] sm:$0xff]  ;;  %v170_v12 = vld [vmem:[%s2756_s2 + $0x1e0] sm:$0xff] }
  0x5c   :  { %v2043_v13 = vpop.permute.xlu2 %196 }
  0x62   :  { %366 = vperm.xlu2 %1784, %v148_v14   ;;  %v1730_v14 = vld [vmem:[%s2755_s1 + $0x30] sm:$0xff] }
  0x63   :  { %361 = vperm.xlu1 %1783, %v147_v15   ;;  %356 = vperm.xlu0 %1782, %v146_v16   ;;  %v1738_v15 = vld [vmem:[%s2755_s1 + $0x70] sm:$0xff] }
  0x64   :  { %v2068_v21 = vpop.permute.xlu2 %201  ;;  %v1746_v16 = vld [vmem:[%s2755_s1 + $0xb0] sm:$0xff] }
  0x65   :  { %1694 = vmatmul.msk.bf16.gmra.mxu0 %vm654_vm0, %v1726_v17  ;;  %1702 = vmatmul.msk.bf16.gmra.mxu1 %vm654_vm0, %v1734_v18  ;;  %v1754_v17 = vld [vmem:[%s2755_s1 + $0xf0] sm:$0xff] }
  0x66   :  { %1710 = vmatmul.msk.bf16.gmra.mxu2 %vm654_vm0, %v1742_v19  ;;  %1718 = vmatmul.msk.bf16.gmra.mxu3 %vm654_vm0, %v1750_v20 }
  0x6a   :  { %381 = vperm.xlu2 %1784, %v151_v22   ;;  %v1009_v22 = vld [vmem:[%s2757_s3 + $0x8] sm:$0xff] }
  0x6b   :  { %376 = vperm.xlu1 %1783, %v150_v23   ;;  %371 = vperm.xlu0 %1782, %v149_v24   ;;  %v1008_v23 = vld [vmem:[%s2757_s3] sm:$0xff]  ;;  %v173_v24 = vld [vmem:[%s2756_s2 + $0x1f8] sm:$0xff] }
  0x6c   :  { %v2081_v25 = vpop.permute.xlu2 %216 }
  0x72   :  { %396 = vperm.xlu2 %1784, %v154_v26  }
  0x73   :  { %391 = vperm.xlu1 %1783, %v153_v27   ;;  %386 = vperm.xlu0 %1782, %v152_v28  }
  0x74   :  { %v2106_v33 = vpop.permute.xlu2 %231 }
  0x75   :  { %1695 = vmatmul.msk.bf16.gmra.mxu0 %vm654_vm0, %v1727_v29  ;;  %1703 = vmatmul.msk.bf16.gmra.mxu1 %vm654_vm0, %v1735_v30  ;;  %v2110_v34 = vpop.permute.xlu1 %186  ;;  %v2112_v35 = vpop.permute.xlu0 %176  ;;  %v1012_v29 = vld [vmem:[%s2757_s3 + $0x20] sm:$0xff]  ;;  %v1011_v30 = vld [vmem:[%s2757_s3 + $0x18] sm:$0xff] }
  0x76   :  { %1711 = vmatmul.msk.bf16.gmra.mxu2 %vm654_vm0, %v1743_v31  ;;  %1719 = vmatmul.msk.bf16.gmra.mxu3 %vm654_vm0, %v1751_v32  ;;  %v1010_v31 = vld [vmem:[%s2757_s3 + $0x10] sm:$0xff]  ;;  %v1731_v32 = vld [vmem:[%s2755_s1 + $0x38] sm:$0xff] }
  0x7a   :  { %411 = vperm.xlu2 %1784, %v157_v36   ;;  %v1739_v36 = vld [vmem:[%s2755_s1 + $0x78] sm:$0xff] }
  0x7b   :  { %406 = vperm.xlu1 %1783, %v156_v37   ;;  %401 = vperm.xlu0 %1782, %v155_v38   ;;  %v1747_v37 = vld [vmem:[%s2755_s1 + $0xb8] sm:$0xff] }
  0x7c   :  { %v2123_v39 = vpop.permute.xlu2 %246  ;;  %v1755_v38 = vld [vmem:[%s2755_s1 + $0xf8] sm:$0xff] }
  0x7d   :  { %v2125_v40 = vpop.permute.xlu1 %191  ;;  %v2127_v41 = vpop.permute.xlu0 %181 }
  0x82   :  { %426 = vperm.xlu2 %1784, %v160_v42  }
  0x83   :  { %421 = vperm.xlu1 %1783, %v159_v43   ;;  %416 = vperm.xlu0 %1782, %v158_v44  }
  0x84   :  { %v2152_v49 = vpop.permute.xlu2 %261 }
  0x85   :  { %1696 = vmatmul.msk.bf16.gmra.mxu0 %vm654_vm0, %v1728_v45  ;;  %1704 = vmatmul.msk.bf16.gmra.mxu1 %vm654_vm0, %v1736_v46  ;;  %v2156_v50 = vpop.permute.xlu1 %211  ;;  %v2158_v51 = vpop.permute.xlu0 %206  ;;  %v1015_v45 = vld [vmem:[%s2757_s3 + $0x38] sm:$0xff]  ;;  %v1014_v46 = vld [vmem:[%s2757_s3 + $0x30] sm:$0xff] }
  0x86   :  { %1712 = vmatmul.msk.bf16.gmra.mxu2 %vm654_vm0, %v1744_v47  ;;  %1720 = vmatmul.msk.bf16.gmra.mxu3 %vm654_vm0, %v1752_v48  ;;  %v1013_v47 = vld [vmem:[%s2757_s3 + $0x28] sm:$0xff] }
  0x8a   :  { %441 = vperm.xlu2 %1784, %v163_v52  }
  0x8b   :  { %436 = vperm.xlu1 %1783, %v162_v53   ;;  %431 = vperm.xlu0 %1782, %v161_v54   ;;  %v1018_v54 = vld [vmem:[%s2757_s3 + $0x50] sm:$0xff] }
  0x8c   :  { %v2169_v55 = vpop.permute.xlu2 %276 }
  0x8d   :  { %v2171_v56 = vpop.permute.xlu1 %226  ;;  %v2173_v57 = vpop.permute.xlu0 %221 }
  0x92   :  { %456 = vperm.xlu2 %1784, %v166_v58   ;;  %v1017_v58 = vld [vmem:[%s2757_s3 + $0x48] sm:$0xff] }
  0x93   :  { %451 = vperm.xlu1 %1783, %v165_v59   ;;  %446 = vperm.xlu0 %1782, %v164_v60   ;;  %v1016_v59 = vld [vmem:[%s2757_s3 + $0x40] sm:$0xff] }
  0x94   :  { %v2198_v1 = vpop.permute.xlu2 %291 }
  0x95   :  { %1697 = vmatmul.msk.bf16.gmra.mxu0 %vm654_vm0, %v1729_v61  ;;  %1705 = vmatmul.msk.bf16.gmra.mxu1 %vm654_vm0, %v1737_v62  ;;  %v2202_v2 = vpop.permute.xlu1 %241  ;;  %v2204_v3 = vpop.permute.xlu0 %236 }
  0x96   :  { %1713 = vmatmul.msk.bf16.gmra.mxu2 %vm654_vm0, %v1745_v63  ;;  %1721 = vmatmul.msk.bf16.gmra.mxu3 %vm654_vm0, %v1753_v0 }
  0x9a   :  { %471 = vperm.xlu2 %1784, %v169_v4  }
  0x9b   :  { %466 = vperm.xlu1 %1783, %v168_v5   ;;  %461 = vperm.xlu0 %1782, %v167_v6   ;;  %v1021_v5 = vld [vmem:[%s2757_s3 + $0x68] sm:$0xff] }
  0x9c   :  { %v2215_v7 = vpop.permute.xlu2 %306 }
  0x9d   :  { %v257_v8 = vpop.permute.xlu1 %256  ;;  %v2217_v9 = vpop.permute.xlu0 %251 }
  0xa2   :  { %486 = vperm.xlu2 %1784, %v172_v10  }
  0xa3   :  { %481 = vperm.xlu1 %1783, %v171_v11   ;;  %476 = vperm.xlu0 %1782, %v170_v12   ;;  %v1019_v11 = vld [vmem:[%s2757_s3 + $0x58] sm:$0xff] }
  0xa4   :  { %v2242_v18 = vpop.permute.xlu2 %321 }
  0xa5   :  { %1698 = vmatmul.msk.bf16.gmra.mxu0 %vm654_vm0, %v1730_v14  ;;  %1706 = vmatmul.msk.bf16.gmra.mxu1 %vm654_vm0, %v1738_v15  ;;  %v2246_v19 = vpop.permute.xlu1 %271  ;;  %v2248_v20 = vpop.permute.xlu0 %266 }
  0xa6   :  { %1714 = vmatmul.msk.bf16.gmra.mxu2 %vm654_vm0, %v1746_v16  ;;  %1722 = vmatmul.msk.bf16.gmra.mxu3 %vm654_vm0, %v1754_v17 }
  0xaa   :  { %1079 = vperm.xlu2 %1784, %v1009_v22  }
  0xab   :  { %1074 = vperm.xlu1 %1783, %v1008_v23   ;;  %491 = vperm.xlu0 %1782, %v173_v24   ;;  %v1024_v24 = vld [vmem:[%s2757_s3 + $0x80] sm:$0xff] }
  0xac   :  { %v337_v26 = vpop.permute.xlu2 %336 }
  0xad   :  { %v2259_v27 = vpop.permute.xlu1 %286  ;;  %v2261_v28 = vpop.permute.xlu0 %281 }
  0xb2   :  { %1094 = vperm.xlu2 %1784, %v1012_v29  }
  0xb3   :  { %1089 = vperm.xlu1 %1783, %v1011_v30   ;;  %1084 = vperm.xlu0 %1782, %v1010_v31  }
  0xb4   :  { %v2286_v42 = vpop.permute.xlu2 %351 }
  0xb5   :  { %1699 = vmatmul.msk.bf16.gmra.mxu0 %vm654_vm0, %v1731_v32  ;;  %1707 = vmatmul.msk.bf16.gmra.mxu1 %vm654_vm0, %v1739_v36  ;;  %v2290_v43 = vpop.permute.xlu1 %301  ;;  %v2292_v44 = vpop.permute.xlu0 %296 }
  0xb6   :  { %1715 = vmatmul.msk.bf16.gmra.mxu2 %vm654_vm0, %v1747_v37  ;;  %1723 = vmatmul.msk.bf16.gmra.mxu3 %vm654_vm0, %v1755_v38 }
  0xba   :  { %1109 = vperm.xlu2 %1784, %v1015_v45  }
  0xbb   :  { %1104 = vperm.xlu1 %1783, %v1014_v46   ;;  %1099 = vperm.xlu0 %1782, %v1013_v47   ;;  %v1027_v47 = vld [vmem:[%s2757_s3 + $0x98] sm:$0xff] }
  0xbc   :  { %v2303_v48 = vpop.permute.xlu2 %366 }
  0xbd   :  { %2760 = vst [vmem:[#allocation6_spill] sm:$0xff] %v2303_v48  ;;  %v2305_v52 = vpop.permute.xlu1 %316  ;;  %v2307_v53 = vpop.permute.xlu0 %311 }
  0xc2   :  { %v2318_v60 = vpop.f32.mrf.mxu0  ;;  %v824_v61 = vpop.f32.mrf.mxu1  ;;  %1124 = vperm.xlu2 %1784, %v1018_v54  }
  0xc3   :  { %v2320_v62 = vadd.f32 %v824_v61, %v257_v8  ;;  %1119 = vperm.xlu1 %1783, %v1017_v58   ;;  %1114 = vperm.xlu0 %1782, %v1016_v59   ;;  %v1020_v8 = vld [vmem:[%s2757_s3 + $0x60] sm:$0xff]  ;;  %v1026_v58 = vld [vmem:[%s2757_s3 + $0x90] sm:$0xff] }
  0xc4   :  { %v2322_v63 = vpop.permute.xlu2 %381 }
  0xc5   :  { %2761 = vst [vmem:[#allocation7_spill] sm:$0xff] %v2322_v63  ;;  %v2324_v0 = vpop.permute.xlu1 %331  ;;  %v2326_v4 = vpop.permute.xlu0 %326  ;;  %v1051_v63 = vld [vmem:[%s2757_s3 + $0x158] sm:$0xff] }
  0xc9   :  { %v864_v6 = vpop.f32.mrf.mxu2  ;;  %v2331_v10 = vpop.f32.mrf.mxu3 }
  0xca   :  { %v2339_v12 = vadd.f32 %v864_v6, %v337_v26  ;;  %v2341_v14 = vpop.f32.mrf.mxu0  ;;  %v826_v15 = vpop.f32.mrf.mxu1  ;;  %1139 = vperm.xlu2 %1784, %v1021_v5   ;;  %v1023_v26 = vld [vmem:[%s2757_s3 + $0x78] sm:$0xff] }
  0xcb   :  { %v2344_v16 = vadd.f32 %v826_v15, %v2152_v49  ;;  %1134 = vperm.xlu1 %1783, %v1020_v8   ;;  %1129 = vperm.xlu0 %1782, %v1019_v11   ;;  %v1022_v49 = vld [vmem:[%s2757_s3 + $0x70] sm:$0xff] }
  0xcc   :  { %v2346_v17 = vpop.permute.xlu2 %396 }
  0xcd   :  { %2762 = vst [vmem:[#allocation8_spill] sm:$0xff] %v2346_v17  ;;  %v347_v22 = vpop.permute.xlu1 %346  ;;  %v342_v23 = vpop.permute.xlu0 %341  ;;  %v1038_v17 = vld [vmem:[%s2757_s3 + $0xf0] sm:$0xff] }
  0xd1   :  { %v866_v29 = vpop.f32.mrf.mxu2  ;;  %v906_v36 = vpop.f32.mrf.mxu3 }
  0xd2   :  { %v2357_v30 = vadd.f32 %v866_v29, %v342_v23  ;;  %v2359_v31 = vpop.f32.mrf.mxu0  ;;  %v829_v32 = vpop.f32.mrf.mxu1  ;;  %1154 = vperm.xlu2 %1784, %v1024_v24  }
  0xd3   :  { %v2362_v37 = vadd.f32 %v829_v32, %v2248_v20  ;;  %1149 = vperm.xlu1 %1783, %v1023_v26   ;;  %1144 = vperm.xlu0 %1782, %v1022_v49   ;;  %v1025_v20 = vld [vmem:[%s2757_s3 + $0x88] sm:$0xff]  ;;  %v1028_v26 = vld [vmem:[%s2757_s3 + $0xa0] sm:$0xff] }
  0xd4   :  { %v2364_v38 = vpop.permute.xlu2 %411 }
  0xd5   :  { %2763 = vst [vmem:[#allocation9_spill] sm:$0xff] %v2364_v38  ;;  %v2366_v45 = vpop.permute.xlu1 %361  ;;  %v357_v46 = vpop.permute.xlu0 %356 }
  0xd6   :  { %2764 = vst [vmem:[#allocation10_spill] sm:$0xff] %v2366_v45  ;;  %v1054_v45 = vld [vmem:[%s2757_s3 + $0x170] sm:$0xff] }
  0xd9   :  { %v869_v54 = vpop.f32.mrf.mxu2  ;;  %v909_v8 = vpop.f32.mrf.mxu3 }
  0xda   :  { %v2377_v59 = vadd.f32 %v869_v54, %v347_v22  ;;  %v2379_v61 = vpop.f32.mrf.mxu0  ;;  %v831_v5 = vpop.f32.mrf.mxu1  ;;  %1169 = vperm.xlu2 %1784, %v1027_v47   ;;  %v1030_v22 = vld [vmem:[%s2757_s3 + $0xb0] sm:$0xff] }
  0xdb   :  { %v2382_v6 = vadd.f32 %v831_v5, %v2246_v19  ;;  %1164 = vperm.xlu1 %1783, %v1026_v58   ;;  %1159 = vperm.xlu0 %1782, %v1025_v20   ;;  %v1029_v19 = vld [vmem:[%s2757_s3 + $0xa8] sm:$0xff] }
  0xdc   :  { %2765 = vst [vmem:[#allocation11_spill] sm:$0xff] %v2377_v59  ;;  %v427_v11 = vpop.permute.xlu2 %426  ;;  %v1033_v20 = vld [vmem:[%s2757_s3 + $0xc8] sm:$0xff] }
  0xdd   :  { %v2384_v15 = vadd.f32 %v909_v8, %v427_v11  ;;  %v2386_v23 = vpop.permute.xlu1 %376  ;;  %v2388_v24 = vpop.permute.xlu0 %371  ;;  %v1031_v8 = vld [vmem:[%s2757_s3 + $0xb8] sm:$0xff] }
  0xde   :  { %2767 = vst [vmem:[#allocation13_spill] sm:$0xff] %v2386_v23  ;;  %v785_v23 = vadd.f32 %v2318_v60, %v2112_v35 }
  0xdf   :  { %2766 = vst [vmem:[#allocation12_spill] sm:$0xff] %v2384_v15 }
  0xe0   :  { %2768 = vst [vmem:[#allocation14_spill] sm:$0xff] %v2388_v24  ;;  %v787_v24 = vadd.f32 %v2341_v14, %v2127_v41 }
  0xe1   :  { %v871_v29 = vpop.f32.mrf.mxu2 }
  0xe2   :  { %v2400_v49 = vadd.f32 %v871_v29, %v2286_v42  ;;  %v2402_v32 = vpop.f32.mrf.mxu0  ;;  %1184 = vperm.xlu2 %1784, %v1030_v22   ;;  %v1032_v42 = vld [vmem:[%s2757_s3 + $0xc0] sm:$0xff]  ;;  %v945_v35 = vmax.f32 %v787_v24, 0.0 }
  0xe3   :  { %1179 = vperm.xlu1 %1783, %v1029_v19   ;;  %1174 = vperm.xlu0 %1782, %v1028_v26  }
  0xe4   :  { %2769 = vst [vmem:[#allocation15_spill] sm:$0xff] %v2400_v49  ;;  %v2404_v47 = vpop.permute.xlu2 %441  ;;  %v790_v49 = vadd.f32 %v2359_v31, %v2110_v34  ;;  %v795_v34 = vadd.f32 %v2402_v32, %v2043_v13  ;;  %v1056_v13 = vld [vmem:[%s2757_s3 + $0x180] sm:$0xff]  ;;  %v1055_v32 = vld [vmem:[%s2757_s3 + $0x178] sm:$0xff] }
  0xe5   :  { %2770 = vst [vmem:[#allocation16_spill] sm:$0xff] %v2404_v47  ;;  %v2406_v54 = vpop.permute.xlu1 %391  ;;  %v2408_v58 = vpop.permute.xlu0 %386  ;;  %v1036_v47 = vld [vmem:[%s2757_s3 + $0xe0] sm:$0xff] }
  0xe6   :  { %2771 = vst [vmem:[#allocation17_spill] sm:$0xff] %v2406_v54 }
  0xe7   :  { %2772 = vst [vmem:[#allocation18_spill] sm:$0xff] %v2408_v58  ;;  %v1047_v58 = vld [vmem:[%s2757_s3 + $0x138] sm:$0xff] }
  0xe9   :  { %v874_v5 = vpop.f32.mrf.mxu2 }
  0xea   :  { %v2419_v11 = vadd.f32 %v874_v5, %v357_v46  ;;  %v2421_v22 = vpop.f32.mrf.mxu0  ;;  %1199 = vperm.xlu2 %1784, %v1033_v20   ;;  %v1035_v46 = vld [vmem:[%s2757_s3 + $0xd8] sm:$0xff]  ;;  %v1034_v20 = vld [vmem:[%s2757_s3 + $0xd0] sm:$0xff] }
  0xeb   :  { %1194 = vperm.xlu1 %1783, %v1032_v42   ;;  %1189 = vperm.xlu0 %1782, %v1031_v8   ;;  %v911_v42 = vpop.f32.mrf.mxu3 }
  0xec   :  { %2773 = vst [vmem:[#allocation19_spill] sm:$0xff] %v2419_v11  ;;  %v2423_v29 = vpop.permute.xlu2 %456 }
  0xed   :  { %2774 = vst [vmem:[#allocation20_spill] sm:$0xff] %v2423_v29  ;;  %v2425_v19 = vpop.permute.xlu1 %406  ;;  %v2427_v26 = vpop.permute.xlu0 %401 }
  0xee   :  { %2775 = vst [vmem:[#allocation21_spill] sm:$0xff] %v2425_v19 }
  0xef   :  { %2776 = vst [vmem:[#allocation22_spill] sm:$0xff] %v2427_v26  ;;  %v1039_v26 = vld [vmem:[%s2757_s3 + $0xf8] sm:$0xff] }
  0xf2   :  { %v2438_v5 = vpop.f32.mrf.mxu0  ;;  %1214 = vperm.xlu2 %1784, %v1036_v47   ;;  %v1037_v47 = vld [vmem:[%s2757_s3 + $0xe8] sm:$0xff] }
  0xf3   :  { %1209 = vperm.xlu1 %1783, %v1035_v46   ;;  %1204 = vperm.xlu0 %1782, %v1034_v20  }
  0xf4   :  { %v2440_v8 = vpop.permute.xlu2 %471 }
  0xf5   :  { %2777 = vst [vmem:[#allocation23_spill] sm:$0xff] %v2440_v8  ;;  %v422_v29 = vpop.permute.xlu1 %421  ;;  %v417_v15 = vpop.permute.xlu0 %416 }
  0xf6   :  { %v2442_v38 = vadd.f32 %v906_v36, %v422_v29  ;;  %v2445_v19 = vadd.f32 %v2331_v10, %v417_v15  ;;  %v2458_v36 = vpop.f32.mrf.mxu1  ;;  %v914_v10 = vpop.f32.mrf.mxu3 }
  0xf8   :  { %2778 = vst [vmem:[#allocation24_spill] sm:$0xff] %v2442_v38 }
  0xf9   :  { %2779 = vst [vmem:[#allocation25_spill] sm:$0xff] %v2445_v19  ;;  %v1042_v19 = vld [vmem:[%s2757_s3 + $0x110] sm:$0xff] }
  0xfa   :  { %v2456_v46 = vpop.f32.mrf.mxu0  ;;  %1229 = vperm.xlu2 %1784, %v1039_v26   ;;  %v1041_v26 = vld [vmem:[%s2757_s3 + $0x108] sm:$0xff] }
  0xfb   :  { %1224 = vperm.xlu1 %1783, %v1038_v17   ;;  %1219 = vperm.xlu0 %1782, %v1037_v47   ;;  %v1040_v17 = vld [vmem:[%s2757_s3 + $0x100] sm:$0xff] }
  0xfc   :  { %v2460_v15 = vpop.permute.xlu2 %486 }
  0xfd   :  { %2780 = vst [vmem:[#allocation26_spill] sm:$0xff] %v2460_v15  ;;  %v437_v29 = vpop.permute.xlu1 %436  ;;  %v432_v20 = vpop.permute.xlu0 %431  ;;  %v1045_v15 = vld [vmem:[%s2757_s3 + $0x128] sm:$0xff] }
  0xfe   :  { %v2462_v8 = vadd.f32 %v914_v10, %v437_v29  ;;  %v2464_v38 = vadd.f32 %v911_v42, %v432_v20  ;;  %v2481_v20 = vpop.f32.mrf.mxu1 }
 0x100   :  { %2781 = vst [vmem:[#allocation27_spill] sm:$0xff] %v2462_v8  ;;  %v1044_v8 = vld [vmem:[%s2757_s3 + $0x120] sm:$0xff] }
 0x101   :  { %2782 = vst [vmem:[#allocation28_spill] sm:$0xff] %v2464_v38  ;;  %v1048_v38 = vld [vmem:[%s2757_s3 + $0x140] sm:$0xff] }
 0x102   :  { %v2475_v47 = vpop.f32.mrf.mxu0  ;;  %1244 = vperm.xlu2 %1784, %v1042_v19   ;;  %v1043_v19 = vld [vmem:[%s2757_s3 + $0x118] sm:$0xff] }
 0x103   :  { %1239 = vperm.xlu1 %1783, %v1041_v26   ;;  %1234 = vperm.xlu0 %1782, %v1040_v17  }
 0x104   :  { %v1080_v10 = vpop.permute.xlu2 %1079 }
 0x105   :  { %v2477_v42 = vpop.permute.xlu1 %451  ;;  %v2479_v29 = vpop.permute.xlu0 %446  ;;  %v1393_v48 = vmul.f32 %v1080_v10, %v945_v35  ;;  %v792_v10 = vadd.f32 %v2379_v61, %v2125_v40  ;;  %v948_v40 = vmax.f32 %v795_v34, 0.0 }
 0x106   :  { %2783 = vst [vmem:[#allocation29_spill] sm:$0xff] %v2477_v42  ;;  %v2501_v54 = vpop.f32.mrf.mxu1 }
 0x107   :  { %2784 = vst [vmem:[#allocation30_spill] sm:$0xff] %v2479_v29 }
 0x10a   :  { %v2492_v26 = vpop.f32.mrf.mxu0  ;;  %1259 = vperm.xlu2 %1784, %v1045_v15  }
 0x10b   :  { %1254 = vperm.xlu1 %1783, %v1044_v8   ;;  %1249 = vperm.xlu0 %1782, %v1043_v19   ;;  %v1046_v8 = vld [vmem:[%s2757_s3 + $0x130] sm:$0xff] }
 0x10c   :  { %v1095_v17 = vpop.permute.xlu2 %1094 }
 0x10d   :  { %v2494_v42 = vpop.permute.xlu1 %466  ;;  %v2496_v29 = vpop.permute.xlu0 %461 }
 0x10e   :  { %2785 = vst [vmem:[#allocation31_spill] sm:$0xff] %v2494_v42 }
 0x10f   :  { %2786 = vst [vmem:[#allocation32_spill] sm:$0xff] %v2496_v29 }
 0x112   :  { %v2509_v15 = vpop.f32.mrf.mxu0  ;;  %1274 = vperm.xlu2 %1784, %v1048_v38   ;;  %v1050_v38 = vld [vmem:[%s2757_s3 + $0x150] sm:$0xff] }
 0x113   :  { %1269 = vperm.xlu1 %1783, %v1047_v58   ;;  %1264 = vperm.xlu0 %1782, %v1046_v8   ;;  %v1049_v58 = vld [vmem:[%s2757_s3 + $0x148] sm:$0xff] }
 0x114   :  { %v2511_v19 = vpop.permute.xlu2 %1109 }
 0x115   :  { %v2513_v42 = vpop.permute.xlu1 %481  ;;  %v2515_v29 = vpop.permute.xlu0 %476 }
 0x116   :  { %2787 = vst [vmem:[#allocation33_spill] sm:$0xff] %v2513_v42  ;;  %v2532_v42 = vpop.f32.mrf.mxu1 }
 0x117   :  { %2788 = vst [vmem:[#allocation34_spill] sm:$0xff] %v2515_v29  ;;  %v944_v29 = vmax.f32 %v785_v23, 0.0  ;;  %v1052_v23 = vld [vmem:[%s2757_s3 + $0x160] sm:$0xff] }
 0x11a   :  { %v2530_v8 = vpop.f32.mrf.mxu0  ;;  %1289 = vperm.xlu2 %1784, %v1051_v63   ;;  %v1053_v63 = vld [vmem:[%s2757_s3 + $0x168] sm:$0xff] }
 0x11b   :  { %1284 = vperm.xlu1 %1783, %v1050_v38   ;;  %1279 = vperm.xlu0 %1782, %v1049_v58   ;;  %v947_v58 = vmax.f32 %v792_v10, 0.0 }
 0x11c   :  { %v2534_v60 = vpop.permute.xlu2 %1124 }
 0x11d   :  { %v1075_v41 = vpop.permute.xlu1 %1074  ;;  %v2536_v14 = vpop.permute.xlu0 %491 }
 0x11e   :  { %2789 = vst [vmem:[#allocation35_spill] sm:$0xff] %v2536_v14  ;;  %v1392_v11 = vmul.f32 %v1075_v41, %v944_v29  ;;  %v946_v29 = vmax.f32 %v790_v49, 0.0  ;;  %v1057_v41 = vld [vmem:[%s2757_s3 + $0x188] sm:$0xff] }
 0x120   :  { %v1456_v59 = vadd.f32 %v1393_v48, %v1392_v11  ;;  %v2555_v48 = vpop.f32.mrf.mxu1 }
 0x122   :  { %v2549_v24 = vpop.f32.mrf.mxu0  ;;  %1304 = vperm.xlu2 %1784, %v1054_v45   ;;  %v797_v45 = vadd.f32 %v2421_v22, %v2068_v21 }
 0x123   :  { %1299 = vperm.xlu1 %1783, %v1053_v63   ;;  %1294 = vperm.xlu0 %1782, %v1052_v23   ;;  %v800_v63 = vadd.f32 %v2438_v5, %v2158_v51  ;;  %v1396_v23 = vmul.f32 %v1095_v17, %v948_v40  ;;  %v1060_v51 = vld [vmem:[%s2757_s3 + $0x1a0] sm:$0xff]  ;;  %v2581_v5 = vpop.f32.mrf.mxu2  ;;  %v805_v17 = vadd.f32 %v2475_v47, %v2081_v25 }
 0x124   :  { %v2557_v31 = vpop.permute.xlu2 %1139  ;;  %v949_v21 = vmax.f32 %v797_v45, 0.0  ;;  %v1059_v45 = vld [vmem:[%s2757_s3 + $0x198] sm:$0xff] }
 0x125   :  { %v1090_v11 = vpop.permute.xlu1 %1089  ;;  %v1085_v38 = vpop.permute.xlu0 %1084 }
 0x126   :  { %v1394_v35 = vmul.f32 %v1085_v38, %v946_v29  ;;  %v1395_v61 = vmul.f32 %v1090_v11, %v947_v58  ;;  %v950_v38 = vmax.f32 %v800_v63, 0.0  ;;  %v802_v58 = vadd.f32 %v2456_v46, %v2156_v50  ;;  %v1058_v50 = vld [vmem:[%s2757_s3 + $0x190] sm:$0xff] }
 0x128   :  { %v1457_v49 = vadd.f32 %v1456_v59, %v1394_v35  ;;  %v2576_v35 = vpop.f32.mrf.mxu1  ;;  %v951_v46 = vmax.f32 %v802_v58, 0.0 }
 0x12a   :  { %v1458_v10 = vadd.f32 %v1457_v49, %v1395_v61  ;;  %v816_v29 = vpop.f32.mrf.mxu0  ;;  %1319 = vperm.xlu2 %1784, %v1057_v41   ;;  %v807_v61 = vadd.f32 %v2492_v26, %v2173_v57  ;;  %v1399_v25 = vmul.f32 %v2511_v19, %v951_v46  ;;  %v1063_v57 = vld [vmem:[%s2757_s3 + $0x1b8] sm:$0xff]  ;;  %v812_v19 = vadd.f32 %v2530_v8, %v2106_v33 }
 0x12b   :  { %1314 = vperm.xlu1 %1783, %v1056_v13   ;;  %1309 = vperm.xlu0 %1782, %v1055_v32   ;;  %v952_v13 = vmax.f32 %v805_v17, 0.0 }
 0x12c   :  { %v2572_v22 = vpop.permute.xlu2 %1154  ;;  %v1459_v59 = vadd.f32 %v1458_v10, %v1396_v23  ;;  %v953_v23 = vmax.f32 %v807_v61, 0.0  ;;  %v810_v10 = vadd.f32 %v2509_v15, %v2171_v56  ;;  %v1061_v56 = vld [vmem:[%s2757_s3 + $0x1a8] sm:$0xff]  ;;  %v2611_v15 = vpop.f32.mrf.mxu2  ;;  %v955_v33 = vmax.f32 %v812_v19, 0.0 }
 0x12d   :  { %v1105_v34 = vpop.permute.xlu1 %1104  ;;  %v1100_v11 = vpop.permute.xlu0 %1099 }
 0x12e   :  { %v1397_v14 = vmul.f32 %v1100_v11, %v949_v21  ;;  %v1398_v41 = vmul.f32 %v1105_v34, %v950_v38  ;;  %v1062_v38 = vld [vmem:[%s2757_s3 + $0x1b0] sm:$0xff]  ;;  %v954_v58 = vmax.f32 %v810_v10, 0.0 }
 0x130   :  { %v1460_v40 = vadd.f32 %v1459_v59, %v1397_v14  ;;  %v2601_v26 = vpop.f32.mrf.mxu1  ;;  %v1402_v8 = vmul.f32 %v2534_v60, %v954_v58  ;;  %v1064_v60 = vld [vmem:[%s2757_s3 + $0x1c0] sm:$0xff] }
 0x132   :  { %v1461_v49 = vadd.f32 %v1460_v40, %v1398_v41  ;;  %1334 = vperm.xlu2 %1784, %v1060_v51   ;;  %v819_v47 = vpop.f32.mrf.mxu0  ;;  %v815_v51 = vadd.f32 %v2549_v24, %v2204_v3  ;;  %v817_v41 = vadd.f32 %v816_v29, %v2202_v2  ;;  %v1066_v3 = vld [vmem:[%s2757_s3 + $0x1d0] sm:$0xff]  ;;  %v1065_v2 = vld [vmem:[%s2757_s3 + $0x1c8] sm:$0xff] }
 0x133   :  { %1329 = vperm.xlu1 %1783, %v1059_v45   ;;  %1324 = vperm.xlu0 %1782, %v1058_v50  }
 0x134   :  { %v2594_v14 = vpop.permute.xlu2 %1169  ;;  %v1462_v59 = vadd.f32 %v1461_v49, %v1399_v25  ;;  %v956_v46 = vmax.f32 %v815_v51, 0.0  ;;  %v957_v24 = vmax.f32 %v817_v41, 0.0  ;;  %v820_v25 = vadd.f32 %v819_v47, %v2123_v39 }
 0x135   :  { %v1120_v32 = vpop.permute.xlu1 %1119  ;;  %v1115_v63 = vpop.permute.xlu0 %1114  ;;  %v961_v41 = vmax.f32 %v2344_v16, 0.0  ;;  %v1071_v16 = vld [vmem:[%s2757_s3 + $0x1f8] sm:$0xff] }
 0x136   :  { %v1400_v21 = vmul.f32 %v1115_v63, %v952_v13  ;;  %v1401_v34 = vmul.f32 %v1120_v32, %v953_v23  ;;  %v1405_v39 = vmul.f32 %v2557_v31, %v957_v24  ;;  %v958_v47 = vmax.f32 %v820_v25, 0.0  ;;  %v1068_v31 = vld [vmem:[%s2757_s3 + $0x1e0] sm:$0xff] }
 0x138   :  { %v1463_v11 = vadd.f32 %v1462_v59, %v1400_v21  ;;  %v2629_v29 = vpop.f32.mrf.mxu1  ;;  %v2632_v21 = vpop.f32.mrf.mxu2 }
 0x13a   :  { %v1464_v17 = vadd.f32 %v1463_v11, %v1401_v34  ;;  %1349 = vperm.xlu2 %1784, %v1063_v57   ;;  %v821_v13 = vpop.f32.mrf.mxu0 }
 0x13b   :  { %1344 = vperm.xlu1 %1783, %v1062_v38   ;;  %1339 = vperm.xlu0 %1782, %v1061_v56   ;;  %v822_v23 = vadd.f32 %v821_v13, %v2217_v9  ;;  %v1069_v9 = vld [vmem:[%s2757_s3 + $0x1e8] sm:$0xff]  ;;  %v960_v56 = vmax.f32 %v2320_v62, 0.0 }
 0x13c   :  { %v2617_v40 = vpop.permute.xlu2 %1184  ;;  %v1465_v49 = vadd.f32 %v1464_v17, %v1402_v8  ;;  %v1067_v17 = vld [vmem:[%s2757_s3 + $0x1d8] sm:$0xff] }
 0x13d   :  { %v1135_v45 = vpop.permute.xlu1 %1134  ;;  %v1130_v50 = vpop.permute.xlu0 %1129  ;;  %v959_v19 = vmax.f32 %v822_v23, 0.0 }
 0x13e   :  { %v1403_v61 = vmul.f32 %v1130_v50, %v955_v33  ;;  %v1404_v32 = vmul.f32 %v1135_v45, %v956_v46  ;;  %v1408_v33 = vmul.f32 %v2572_v22, %v960_v56  ;;  %v835_v22 = vadd.f32 %v2458_v36, %v2169_v55 }
 0x13f   :  { %v840_v36 = vadd.f32 %v2501_v54, %v2259_v27 }
 0x140   :  { %v1466_v63 = vadd.f32 %v1465_v49, %v1403_v61  ;;  %v854_v45 = vpop.f32.mrf.mxu1  ;;  %v962_v61 = vmax.f32 %v2362_v37, 0.0  ;;  %v2650_v49 = vpop.f32.mrf.mxu2  ;;  %v837_v37 = vadd.f32 %v2481_v20, %v2261_v28  ;;  %v964_v55 = vmax.f32 %v835_v22, 0.0 }
 0x142   :  { %v1467_v10 = vadd.f32 %v1466_v63, %v1404_v32  ;;  %1364 = vperm.xlu2 %1784, %v1066_v3   ;;  %v963_v3 = vmax.f32 %v2382_v6, 0.0  ;;  %v1070_v63 = vld [vmem:[%s2757_s3 + $0x1f0] sm:$0xff] }
 0x143   :  { %1359 = vperm.xlu1 %1783, %v1065_v2   ;;  %1354 = vperm.xlu0 %1782, %v1064_v60  }
 0x144   :  { %v2635_v34 = vpop.permute.xlu2 %1199  ;;  %v1468_v38 = vadd.f32 %v1467_v10, %v1405_v39  ;;  %v1411_v2 = vmul.f32 %v2594_v14, %v963_v3  ;;  %v965_v39 = vmax.f32 %v837_v37, 0.0 }
 0x145   :  { %v1150_v59 = vpop.permute.xlu1 %1149  ;;  %v1145_v57 = vpop.permute.xlu0 %1144 }
 0x146   :  { %v1406_v11 = vmul.f32 %v1145_v57, %v958_v47  ;;  %v1407_v58 = vmul.f32 %v1150_v59, %v959_v19  ;;  %v966_v57 = vmax.f32 %v840_v36, 0.0  ;;  %v842_v19 = vadd.f32 %v2532_v42, %v2198_v1 }
 0x147   :  { %v847_v1 = vadd.f32 %v2576_v35, %v2290_v43 }
 0x148   :  { %v1469_v51 = vadd.f32 %v1468_v38, %v1406_v11  ;;  %v856_v59 = vpop.f32.mrf.mxu1  ;;  %v2668_v28 = vpop.f32.mrf.mxu2  ;;  %v845_v38 = vadd.f32 %v2555_v48, %v2292_v44  ;;  %v1414_v27 = vmul.f32 %v2617_v40, %v966_v57  ;;  %v967_v56 = vmax.f32 %v842_v19, 0.0 }
 0x149   :  { %v2670_v11 = vpop.f32.mrf.mxu3  ;;  %v969_v44 = vmax.f32 %v847_v1, 0.0  ;;  %v852_v40 = vadd.f32 %v2629_v29, %v2307_v53  ;;  %v976_v19 = vmax.f32 %v2339_v12, 0.0  ;;  %v2792_v12 = vld [vmem:[#allocation10_spill] sm:$0xff] }
 0x14a   :  { %v1470_v8 = vadd.f32 %v1469_v51, %v1407_v58  ;;  %1379 = vperm.xlu2 %1784, %v1069_v9  }
 0x14b   :  { %1374 = vperm.xlu1 %1783, %v1068_v31   ;;  %1369 = vperm.xlu0 %1782, %v1067_v17   ;;  %v968_v17 = vmax.f32 %v845_v38, 0.0  ;;  %v971_v22 = vmax.f32 %v852_v40, 0.0  ;;  %v2793_v40 = vld [vmem:[#allocation19_spill] sm:$0xff] }
 0x14c   :  { %v1471_v62 = vadd.f32 %v1470_v8, %v1408_v33  ;;  %v1215_v24 = vpop.permute.xlu2 %1214  ;;  %v850_v33 = vadd.f32 %v2601_v26, %v2215_v7  ;;  %v855_v7 = vadd.f32 %v854_v45, %v2305_v52 }
 0x14d   :  { %v1165_v50 = vpop.permute.xlu1 %1164  ;;  %v1160_v46 = vpop.permute.xlu0 %1159 }
 0x14e   :  { %v1409_v13 = vmul.f32 %v1160_v46, %v961_v41  ;;  %v1410_v25 = vmul.f32 %v1165_v50, %v962_v61  ;;  %v970_v61 = vmax.f32 %v850_v33, 0.0  ;;  %v972_v37 = vmax.f32 %v855_v7, 0.0 }
 0x150   :  { %v1472_v32 = vadd.f32 %v1471_v62, %v1409_v13  ;;  %v859_v62 = vpop.f32.mrf.mxu1  ;;  %v2679_v48 = vpop.f32.mrf.mxu2  ;;  %v1417_v13 = vmul.f32 %v2635_v34, %v969_v44 }
 0x151   :  { %v2683_v46 = vpop.f32.mrf.mxu3  ;;  %v860_v53 = vadd.f32 %v859_v62, %v2326_v4 }
 0x152   :  { %v1473_v6 = vadd.f32 %v1472_v32, %v1410_v25  ;;  %v857_v32 = vadd.f32 %v856_v59, %v2242_v18 }
 0x153   :  { %1389 = vperm.xlu1 %1783, %v1071_v16   ;;  %1384 = vperm.xlu0 %1782, %v1070_v63   ;;  %v974_v52 = vmax.f32 %v860_v53, 0.0  ;;  %v2796_v53 = vld [vmem:[#allocation13_spill] sm:$0xff] }
 0x154   :  { %v1474_v60 = vadd.f32 %v1473_v6, %v1411_v2  ;;  %v1230_v54 = vpop.permute.xlu2 %1229  ;;  %v973_v34 = vmax.f32 %v857_v32, 0.0 }
 0x155   :  { %v1180_v23 = vpop.permute.xlu1 %1179  ;;  %v1175_v10 = vpop.permute.xlu0 %1174 }
 0x156   :  { %v1412_v47 = vmul.f32 %v1175_v10, %v964_v55  ;;  %v1413_v20 = vmul.f32 %v1180_v23, %v965_v39  ;;  %v1420_v55 = vmul.f32 %v1215_v24, %v972_v37  ;;  %v977_v24 = vmax.f32 %v2357_v30, 0.0 }
 0x158   :  { %v1475_v14 = vadd.f32 %v1474_v60, %v1412_v47  ;;  %v861_v2 = vpop.f32.mrf.mxu1  ;;  %v2689_v6 = vpop.f32.mrf.mxu2 }
 0x159   :  { %v2691_v23 = vpop.f32.mrf.mxu3  ;;  %v862_v45 = vadd.f32 %v861_v2, %v2324_v0 }
 0x15a   :  { %v1476_v9 = vadd.f32 %v1475_v14, %v1413_v20 }
 0x15b   :  { %v975_v57 = vmax.f32 %v862_v45, 0.0 }
 0x15c   :  { %v1477_v58 = vadd.f32 %v1476_v9, %v1414_v27  ;;  %v1245_v43 = vpop.permute.xlu2 %1244 }
 0x15d   :  { %v1195_v51 = vpop.permute.xlu1 %1194  ;;  %v1190_v31 = vpop.permute.xlu0 %1189  ;;  %v1423_v20 = vmul.f32 %v1230_v54, %v975_v57  ;;  %v877_v54 = vadd.f32 %v2581_v5, %v2792_v12 }
 0x15e   :  { %v1415_v42 = vmul.f32 %v1190_v31, %v967_v56  ;;  %v1416_v8 = vmul.f32 %v1195_v51, %v968_v17 }
 0x160   :  { %v1478_v41 = vadd.f32 %v1477_v58, %v1415_v42  ;;  %v894_v27 = vpop.f32.mrf.mxu2  ;;  %v2790_v58 = vld [vmem:[#allocation11_spill] sm:$0xff] }
 0x161   :  { %v978_v51 = vmax.f32 %v2790_v58, 0.0  ;;  %v2697_v0 = vpop.f32.mrf.mxu3 }
 0x162   :  { %v1479_v50 = vadd.f32 %v1478_v41, %v1416_v8  ;;  %v2791_v8 = vld [vmem:[#allocation15_spill] sm:$0xff] }
 0x163   :  { %v1426_v42 = vmul.f32 %v1245_v43, %v978_v51  ;;  %v979_v41 = vmax.f32 %v2791_v8, 0.0  ;;  %v2795_v43 = vld [vmem:[#allocation14_spill] sm:$0xff]  ;;  %v2800_v51 = vld [vmem:[#allocation8_spill] sm:$0xff] }
 0x164   :  { %v1480_v25 = vadd.f32 %v1479_v50, %v1417_v13  ;;  %v1260_v10 = vpop.permute.xlu2 %1259  ;;  %v980_v50 = vmax.f32 %v2793_v40, 0.0  ;;  %v981_v13 = vmax.f32 %v877_v54, 0.0  ;;  %v2802_v40 = vld [vmem:[#allocation21_spill] sm:$0xff] }
 0x165   :  { %v1210_v35 = vpop.permute.xlu1 %1209  ;;  %v1205_v3 = vpop.permute.xlu0 %1204 }
 0x166   :  { %v1418_v26 = vmul.f32 %v1205_v3, %v970_v61  ;;  %v1419_v16 = vmul.f32 %v1210_v35, %v971_v22  ;;  %v2794_v35 = vld [vmem:[#allocation6_spill] sm:$0xff] }
 0x167   :  { %v880_v3 = vadd.f32 %v2611_v15, %v2794_v35  ;;  %v2803_v35 = vld [vmem:[#allocation9_spill] sm:$0xff] }
 0x168   :  { %v1481_v63 = vadd.f32 %v1480_v25, %v1418_v26  ;;  %v896_v22 = vpop.f32.mrf.mxu2  ;;  %v882_v25 = vadd.f32 %v2632_v21, %v2795_v43 }
 0x169   :  { %v2707_v32 = vpop.f32.mrf.mxu3  ;;  %v982_v37 = vmax.f32 %v880_v3, 0.0 }
 0x16a   :  { %v1482_v29 = vadd.f32 %v1481_v63, %v1419_v16  ;;  %v1429_v16 = vmul.f32 %v1260_v10, %v981_v13 }
 0x16c   :  { %v1483_v39 = vadd.f32 %v1482_v29, %v1420_v55  ;;  %v1275_v31 = vpop.permute.xlu2 %1274  ;;  %v885_v29 = vadd.f32 %v2650_v49, %v2796_v53  ;;  %v2799_v49 = vld [vmem:[#allocation17_spill] sm:$0xff] }
 0x16d   :  { %v1225_v36 = vpop.permute.xlu1 %1224  ;;  %v1220_v60 = vpop.permute.xlu0 %1219 }
 0x16e   :  { %v1421_v18 = vmul.f32 %v1220_v60, %v973_v34  ;;  %v1422_v47 = vmul.f32 %v1225_v36, %v974_v52  ;;  %v983_v36 = vmax.f32 %v882_v25, 0.0  ;;  %v984_v60 = vmax.f32 %v885_v29, 0.0  ;;  %v2797_v52 = vld [vmem:[#allocation7_spill] sm:$0xff] }
 0x16f   :  { %v887_v45 = vadd.f32 %v2668_v28, %v2797_v52 }
 0x170   :  { %v1484_v59 = vadd.f32 %v1483_v39, %v1421_v18  ;;  %v2798_v39 = vld [vmem:[#allocation18_spill] sm:$0xff] }
 0x171   :  { %v890_v10 = vadd.f32 %v2679_v48, %v2798_v39 }
 0x172   :  { %v1485_v4 = vadd.f32 %v1484_v59, %v1422_v47  ;;  %v899_v47 = vpop.f32.mrf.mxu2  ;;  %v1432_v59 = vmul.f32 %v1275_v31, %v984_v60 }
 0x174   :  { %v1486_v56 = vadd.f32 %v1485_v4, %v1423_v20  ;;  %v1290_v5 = vpop.permute.xlu2 %1289  ;;  %v985_v4 = vmax.f32 %v887_v45, 0.0  ;;  %v892_v20 = vadd.f32 %v2689_v6, %v2799_v49  ;;  %v2808_v49 = vld [vmem:[#allocation16_spill] sm:$0xff] }
 0x175   :  { %v1240_v14 = vpop.permute.xlu1 %1239  ;;  %v1235_v38 = vpop.permute.xlu0 %1234 }
 0x176   :  { %v1424_v9 = vmul.f32 %v1235_v38, %v976_v19  ;;  %v1425_v17 = vmul.f32 %v1240_v14, %v977_v24  ;;  %v2715_v19 = vpop.f32.mrf.mxu3  ;;  %v987_v58 = vmax.f32 %v892_v20, 0.0  ;;  %v917_v20 = vadd.f32 %v2670_v11, %v2808_v49  ;;  %v2819_v49 = vld [vmem:[#allocation35_spill] sm:$0xff] }
 0x178   :  { %v1487_v1 = vadd.f32 %v1486_v56, %v1424_v9  ;;  %v986_v56 = vmax.f32 %v890_v10, 0.0 }
 0x17a   :  { %v1488_v33 = vadd.f32 %v1487_v1, %v1425_v17  ;;  %v895_v17 = vadd.f32 %v894_v27, %v2800_v51  ;;  %v901_v12 = vpop.f32.mrf.mxu2 }
 0x17b   :  { %v902_v27 = vadd.f32 %v901_v12, %v2803_v35 }
 0x17c   :  { %v1489_v62 = vadd.f32 %v1488_v33, %v1426_v42  ;;  %v1305_v14 = vpop.permute.xlu2 %1304  ;;  %v2801_v42 = vld [vmem:[#allocation22_spill] sm:$0xff]  ;;  %v1435_v33 = vmul.f32 %v1290_v5, %v987_v58 }
 0x17d   :  { %v1255_v44 = vpop.permute.xlu1 %1254  ;;  %v1250_v30 = vpop.permute.xlu0 %1249  ;;  %v897_v31 = vadd.f32 %v896_v22, %v2801_v42  ;;  %v991_v43 = vmax.f32 %v902_v27, 0.0  ;;  %v2811_v42 = vld [vmem:[#allocation29_spill] sm:$0xff]  ;;  %v2814_v27 = vld [vmem:[#allocation31_spill] sm:$0xff] }
 0x17e   :  { %v1427_v61 = vmul.f32 %v1250_v30, %v979_v41  ;;  %v1428_v7 = vmul.f32 %v1255_v44, %v980_v50  ;;  %v988_v41 = vmax.f32 %v895_v17, 0.0  ;;  %v2721_v44 = vpop.f32.mrf.mxu3  ;;  %v900_v50 = vadd.f32 %v899_v47, %v2802_v40 }
 0x17f   :  { %v989_v30 = vmax.f32 %v897_v31, 0.0  ;;  %v922_v31 = vadd.f32 %v2691_v23, %v2811_v42  ;;  %v930_v23 = vadd.f32 %v2715_v19, %v2814_v27 }
 0x180   :  { %v1490_v26 = vadd.f32 %v1489_v62, %v1427_v61 }
 0x182   :  { %v1491_v63 = vadd.f32 %v1490_v26, %v1428_v7  ;;  %v990_v26 = vmax.f32 %v900_v50, 0.0 }
 0x184   :  { %v1492_v2 = vadd.f32 %v1491_v63, %v1429_v16  ;;  %v1320_v61 = vpop.permute.xlu2 %1319  ;;  %v1438_v25 = vmul.f32 %v1305_v14, %v990_v26  ;;  %v2804_v63 = vld [vmem:[#allocation25_spill] sm:$0xff]  ;;  %v2809_v14 = vld [vmem:[#allocation27_spill] sm:$0xff] }
 0x185   :  { %v1270_v34 = vpop.permute.xlu1 %1269  ;;  %v1265_v55 = vpop.permute.xlu0 %1264 }
 0x186   :  { %v1430_v15 = vmul.f32 %v1265_v55, %v982_v37  ;;  %v1431_v18 = vmul.f32 %v1270_v34, %v983_v36  ;;  %v992_v37 = vmax.f32 %v2804_v63, 0.0  ;;  %v934_v55 = vpop.f32.mrf.mxu3 }
 0x188   :  { %v1493_v21 = vadd.f32 %v1492_v2, %v1430_v15  ;;  %v2805_v2 = vld [vmem:[#allocation24_spill] sm:$0xff] }
 0x189   :  { %v993_v34 = vmax.f32 %v2805_v2, 0.0 }
 0x18a   :  { %v1494_v57 = vadd.f32 %v1493_v21, %v1431_v18  ;;  %v2806_v18 = vld [vmem:[#allocation12_spill] sm:$0xff] }
 0x18b   :  { %v1441_v52 = vmul.f32 %v1320_v61, %v993_v34  ;;  %v994_v21 = vmax.f32 %v2806_v18, 0.0 }
 0x18c   :  { %v1495_v38 = vadd.f32 %v1494_v57, %v1432_v59  ;;  %v1335_v36 = vpop.permute.xlu2 %1334  ;;  %v2807_v59 = vld [vmem:[#allocation28_spill] sm:$0xff] }
 0x18d   :  { %v1285_v24 = vpop.permute.xlu1 %1284  ;;  %v1280_v9 = vpop.permute.xlu0 %1279  ;;  %v995_v57 = vmax.f32 %v2807_v59, 0.0  ;;  %v2818_v59 = vld [vmem:[#allocation26_spill] sm:$0xff] }
 0x18e   :  { %v1433_v28 = vmul.f32 %v1280_v9, %v985_v4  ;;  %v1434_v1 = vmul.f32 %v1285_v24, %v986_v56  ;;  %v2810_v56 = vld [vmem:[#allocation30_spill] sm:$0xff]  ;;  %v936_v58 = vpop.f32.mrf.mxu3 }
 0x190   :  { %v1496_v48 = vadd.f32 %v1495_v38, %v1433_v28  ;;  %v996_v38 = vmax.f32 %v2809_v14, 0.0  ;;  %v920_v28 = vadd.f32 %v2683_v46, %v2810_v56  ;;  %v2813_v46 = vld [vmem:[#allocation32_spill] sm:$0xff] }
 0x191   :  { %v927_v50 = vadd.f32 %v2707_v32, %v2813_v46  ;;  %v2816_v32 = vld [vmem:[#allocation34_spill] sm:$0xff] }
 0x192   :  { %v1497_v8 = vadd.f32 %v1496_v48, %v1434_v1  ;;  %v1444_v51 = vmul.f32 %v1335_v36, %v996_v38  ;;  %v997_v48 = vmax.f32 %v917_v20, 0.0  ;;  %v998_v12 = vmax.f32 %v920_v28, 0.0 }
 0x194   :  { %v1498_v54 = vadd.f32 %v1497_v8, %v1435_v33  ;;  %v1350_v17 = vpop.permute.xlu2 %1349 }
 0x195   :  { %v1300_v62 = vpop.permute.xlu1 %1299  ;;  %v1295_v6 = vpop.permute.xlu0 %1294 }
 0x196   :  { %v1436_v13 = vmul.f32 %v1295_v6, %v988_v41  ;;  %v1437_v3 = vmul.f32 %v1300_v62, %v989_v30  ;;  %v2812_v62 = vld [vmem:[#allocation20_spill] sm:$0xff] }
 0x197   :  { %v925_v6 = vadd.f32 %v2697_v0, %v2812_v62  ;;  %v2815_v0 = vld [vmem:[#allocation23_spill] sm:$0xff] }
 0x198   :  { %v1499_v7 = vadd.f32 %v1498_v54, %v1436_v13  ;;  %v999_v54 = vmax.f32 %v922_v31, 0.0  ;;  %v932_v63 = vadd.f32 %v2721_v44, %v2815_v0 }
 0x199   :  { %v1000_v35 = vmax.f32 %v925_v6, 0.0 }
 0x19a   :  { %v1500_v22 = vadd.f32 %v1499_v7, %v1437_v3  ;;  %v1447_v61 = vmul.f32 %v1350_v17, %v999_v54  ;;  %v939_v3 = vpop.f32.mrf.mxu3  ;;  %v1003_v36 = vmax.f32 %v932_v63, 0.0 }
 0x19c   :  { %v1501_v29 = vadd.f32 %v1500_v22, %v1438_v25  ;;  %v1365_v7 = vpop.permute.xlu2 %1364  ;;  %v1001_v25 = vmax.f32 %v927_v50, 0.0 }
 0x19d   :  { %v1315_v16 = vpop.permute.xlu1 %1314  ;;  %v1310_v5 = vpop.permute.xlu0 %1309 }
 0x19e   :  { %v1439_v53 = vmul.f32 %v1310_v5, %v991_v43  ;;  %v1440_v15 = vmul.f32 %v1315_v16, %v992_v37  ;;  %v1002_v5 = vmax.f32 %v930_v23, 0.0 }
 0x1a0   :  { %v1502_v60 = vadd.f32 %v1501_v29, %v1439_v53  ;;  %v935_v29 = vadd.f32 %v934_v55, %v2816_v32  ;;  %v1450_v2 = vmul.f32 %v1365_v7, %v1002_v5 }
 0x1a2   :  { %v1503_v45 = vadd.f32 %v1502_v60, %v1440_v15  ;;  %v2817_v15 = vld [vmem:[#allocation33_spill] sm:$0xff]  ;;  %v1004_v18 = vmax.f32 %v935_v29, 0.0 }
 0x1a3   :  { %v937_v19 = vadd.f32 %v936_v58, %v2817_v15 }
 0x1a4   :  { %v1504_v39 = vadd.f32 %v1503_v45, %v1441_v52 }
 0x1a5   :  { %v1330_v10 = vpop.permute.xlu1 %1329  ;;  %v1325_v47 = vpop.permute.xlu0 %1324 }
 0x1a6   :  { %v1442_v4 = vmul.f32 %v1325_v47, %v994_v21  ;;  %v1443_v24 = vmul.f32 %v1330_v10, %v995_v57  ;;  %v1380_v10 = vpop.permute.xlu2 %1379  ;;  %v1005_v47 = vmax.f32 %v937_v19, 0.0  ;;  %v940_v57 = vadd.f32 %v939_v3, %v2818_v59 }
 0x1a8   :  { %v1505_v9 = vadd.f32 %v1504_v39, %v1442_v4  ;;  %v941_v39 = vpop.f32.mrf.mxu3  ;;  %v1453_v55 = vmul.f32 %v1380_v10, %v1005_v47  ;;  %v1006_v38 = vmax.f32 %v940_v57, 0.0 }
 0x1a9   :  { %v942_v20 = vadd.f32 %v941_v39, %v2819_v49 }
 0x1aa   :  { %v1506_v1 = vadd.f32 %v1505_v9, %v1443_v24 }
 0x1ab   :  { %v1007_v28 = vmax.f32 %v942_v20, 0.0 }
 0x1ac   :  { %v1507_v33 = vadd.f32 %v1506_v1, %v1444_v51 }
 0x1ad   :  { %v1345_v8 = vpop.permute.xlu1 %1344  ;;  %v1340_v41 = vpop.permute.xlu0 %1339 }
 0x1ae   :  { %v1445_v11 = vmul.f32 %v1340_v41, %v997_v48  ;;  %v1446_v30 = vmul.f32 %v1345_v8, %v998_v12  ;;  %v1526_v41 = vstv %s2758_s4  ;;  %s1555_s4 = sshll.u32 %s2759_s5, 4  ;;  %s1556_s4 = int_to_ptr.hbm [resolvable:$true] %s1555_s4 }
 0x1b0   :  { %v1508_v40 = vadd.f32 %v1507_v33, %v1445_v11 }
 0x1b2   :  { %v1509_v13 = vadd.f32 %v1508_v40, %v1446_v30 }
 0x1b4   :  { %v1510_v26 = vadd.f32 %v1509_v13, %v1447_v61 }
 0x1b5   :  { %v1360_v22 = vpop.permute.xlu1 %1359  ;;  %v1355_v43 = vpop.permute.xlu0 %1354 }
 0x1b6   :  { %v1448_v16 = vmul.f32 %v1355_v43, %v1000_v35  ;;  %v1449_v37 = vmul.f32 %v1360_v22, %v1001_v25 }
 0x1b8   :  { %v1511_v53 = vadd.f32 %v1510_v26, %v1448_v16 }
 0x1ba   :  { %v1512_v34 = vadd.f32 %v1511_v53, %v1449_v37 }
 0x1bc   :  { %v1513_v60 = vadd.f32 %v1512_v34, %v1450_v2 }
 0x1bd   :  { %v1375_v52 = vpop.permute.xlu1 %1374  ;;  %v1370_v45 = vpop.permute.xlu0 %1369 }
 0x1be   :  { %v1451_v21 = vmul.f32 %v1370_v45, %v1003_v36  ;;  %v1452_v44 = vmul.f32 %v1375_v52, %v1004_v18 }
 0x1c0   :  { %v1514_v4 = vadd.f32 %v1513_v60, %v1451_v21 }
 0x1c2   :  { %v1515_v14 = vadd.f32 %v1514_v4, %v1452_v44 }
 0x1c4   :  { %v1516_v24 = vadd.f32 %v1515_v14, %v1453_v55 }
 0x1c5   :  { %v1390_v9 = vpop.permute.xlu1 %1389  ;;  %v1385_v56 = vpop.permute.xlu0 %1384 }
 0x1c6   :  { %v1454_v58 = vmul.f32 %v1385_v56, %v1006_v38  ;;  %v1455_v51 = vmul.f32 %v1390_v9, %v1007_v28 }
 0x1c8   :  { %v1517_v17 = vadd.f32 %v1516_v24, %v1454_v58 }
 0x1ca   :  { %v1518_v1 = vadd.f32 %v1517_v17, %v1455_v51 }
 0x1cc   :  { %v1519_v48 = vrot.slane %v1518_v1, 4 }
 0x1ce   :  { %v1520_v42 = vadd.f32 %v1519_v48, %v1518_v1 }
 0x1d0   :  { %v1521_v31 = vrot.slane %v1520_v42, 2 }
 0x1d2   :  { %v1522_v33 = vadd.f32 %v1521_v31, %v1520_v42 }
 0x1d4   :  { %v1523_v8 = vrot.slane %v1522_v33, 1 }
 0x1d6   :  { %v1524_v12 = vadd.f32 %v1523_v8, %v1522_v33 }
 0x1d8   :  { %v1527_v11 = vadd.f32 %v1526_v41, %v1524_v12 }
 0x1da   :  { %v1528_v54 = vsub.f32 0.0, %v1527_v11 }
 0x1dc   :  { %v1529_v62 = vmul.f32 1.442695, %v1528_v54 }
 0x1de   :  { %1785 = vpow2.f32 %v1529_v62 }
 0x1e4   :  { %v1786_v6 = vpop.eup %1785 }
 0x1e5   :  { %v1531_v30 = vadd.f32 1.0, %v1786_v6 }
 0x1e7   :  { %1787 = vrcp.f32 %v1531_v30  ;;  %v1543_v61 = vand.u32 2147483648, %v1531_v30  ;;  %v1541_v35 = vand.u32 2147483647, %v1531_v30  ;;  %vm1537_vm2 = vweird.f32 %v1531_v30 }
 0x1e9   :  { %v1544_v23 = vor.u32 1.1754944e-38, %v1543_v61  ;;  %vm1542_vm4 = vcmp.eq.f32.partialorder %v1541_v35, 8.507059e+37 }
 0x1ed   :  { %v1788_v40 = vpop.eup %1787 }
 0x1ee   :  { %v1533_v46 = vmul.f32 %v1788_v40, %v1531_v30  ;;  %vm1538_vm1 = vweird.f32 %v1788_v40 }
 0x1ef   :  { %vm1539_vm3 = vmor %vm1537_vm2, %vm1538_vm1 }
 0x1f0   :  { %v1534_v50 = vsub.f32 1.0, %v1533_v46 }
 0x1f2   :  { %v1535_v13 = vmul.f32 %v1788_v40, %v1534_v50 }
 0x1f4   :  { %v1536_v27 = vadd.f32 %v1788_v40, %v1535_v13 }
 0x1f6   :  { %v1540_v3 = vsel %vm1539_vm3, %v1788_v40, %v1536_v27 }
 0x1f7   :  { %v1545_v7 = vsel %vm1542_vm4, %v1544_v23, %v1540_v3 }
 0x1f8   :  { %1547 = vst [vmem:[#allocation3] sm:$0x1] %v1545_v7 }
 0x1f9   :  { %1558 = dma.vmem_to_hbm [thread:$0]  %s1554_s26, 16, %s1556_s4, [#allocation4]  }
 0x1fa   :  { %1813 = dma.done.wait [#allocation4], 16  }
 0x1fb   :  { %1814 = vsyncadd [#allocation4], 4294967280 }
 0x1fc   :  { %1563 = vsyncpa [#allocation4], 1 }

</bundles_post_ra>
